<compile_context>
chip_gen: v6e
topology: v6e:2x2x1
jax: 0.10.0
libtpu: 0.0.40
codegen_flags: <defaults>
</compile_context>

<pallas_src>
import functools

import jax
import jax.numpy as jnp
from jax.experimental import pallas as pl
from jax.experimental.pallas import tpu as pltpu

INPUT = 10
IN_PAD = 16                 # padded feature dim (sublane-aligned K)
HIDDEN = 64
GATES = 4 * HIDDEN          # 256 fused gate lanes, order (f, i, o, g)
NEG_SLOPE = 0.01            # nn.LeakyReLU default


def _leaky(x):
    return jnp.where(x > 0, x, NEG_SLOPE * x)


def _round_up(n, m):
    return ((n + m - 1) // m) * m


def tte_kernel(x_ref,
               wih0_ref, whh0_ref, b0_ref,
               wih1_ref, whh1_ref, b1_ref,
               rw1_ref, rb1_ref, rw2_ref, rb2_ref,
               fw_ref, fb_ref,
               out_ref,
               h0seq_ref):
    """One batch block of the full forward pass (all weights VMEM-resident)."""
    T, bb, _ = x_ref.shape
    H = HIDDEN

    def cell(gates, c):
        # Gate layout (f, i, o, g): sigmoid over lanes 0..191, tanh over
        # 192..255.  f pairs with c at lane offset 0, i and g both sit at
        # offset 64 of their vregs, o pairs with tanh(c_new) at offset 0.
        sig = jax.nn.sigmoid(gates[:, :3 * H])
        g_g = jnp.tanh(gates[:, 3 * H:])
        f_g = sig[:, :H]
        i_g = sig[:, H:2 * H]
        o_g = sig[:, 2 * H:]
        c_new = f_g * c + i_g * g_g
        h_new = o_g * jnp.tanh(c_new)
        return h_new, c_new

    # ---- Hoisted layer-0 input projection: one (T*bb,16)x(16,256) bf16
    # matmul (f32 accumulation), bias folded in.  Off the serial chain.
    x_flat = x_ref[...].reshape(T * bb, IN_PAD).astype(jnp.bfloat16)
    xp0 = jnp.dot(x_flat, wih0_ref[...],
                  preferred_element_type=jnp.float32) + b0_ref[...]

    # ---- Layer-0 recurrence: only h @ Whh0 (f32) on the serial chain.
    # T is small & static -> unrolled; big intermediates (xp0/xp1) are
    # VMEM-resident values, so per-step vreg pressure stays bounded.
    h = jnp.zeros((bb, H), jnp.float32)
    c = jnp.zeros((bb, H), jnp.float32)
    for t in range(T):
        g = xp0[t * bb:(t + 1) * bb, :] + jnp.dot(
            h, whh0_ref[...], preferred_element_type=jnp.float32)
        h, c = cell(g, c)
        h0seq_ref[t * bb:(t + 1) * bb, :] = h.astype(h0seq_ref.dtype)

    # ---- Hoisted layer-1 input projection: one (T*bb,64)x(64,256) bf16
    # matmul from the staged hidden sequence, bias folded in.
    xp1 = jnp.dot(h0seq_ref[...], wih1_ref[...],
                  preferred_element_type=jnp.float32) + b1_ref[...]

    # ---- Layer-1 recurrence.
    h = jnp.zeros((bb, H), jnp.float32)
    c = jnp.zeros((bb, H), jnp.float32)
    for t in range(T):
        g = xp1[t * bb:(t + 1) * bb, :] + jnp.dot(
            h, whh1_ref[...], preferred_element_type=jnp.float32)
        h, c = cell(g, c)

    r = h                                   # r_out[:, -1, :]

    # ---- res: Linear(64,64)->LeakyReLU x2, bf16 operands / f32 accumulation.
    y = _leaky(jnp.dot(r.astype(jnp.bfloat16), rw1_ref[...],
                       preferred_element_type=jnp.float32) + rb1_ref[...])
    y = _leaky(jnp.dot(y.astype(jnp.bfloat16), rw2_ref[...],
                       preferred_element_type=jnp.float32) + rb2_ref[...])

    # ---- fc(res(r) + r): Linear(64,1)+LeakyReLU as VPU multiply + lane
    # reduce; emit lane-dense (1,1,bb) with batch along lanes.
    z = y + r
    head = jnp.sum(z * fw_ref[...], axis=-1, keepdims=True) + fb_ref[...]  # (bb,1)
    out_ref[...] = jnp.transpose(_leaky(head), (1, 0)).reshape(1, 1, bb)


# ---------------------------------------------------------------------------
# Parameter construction (PyTorch-native layouts) and kernel-layout packing.
# ---------------------------------------------------------------------------

def init_torch_params(key):
    """Deterministic params mirroring the PyTorch module's native shapes."""
    H, I = HIDDEN, INPUT
    ks = jax.random.split(key, 14)

    def u(k, shape, bound):
        return jax.random.uniform(k, shape, jnp.float32, -bound, bound)

    b = 1.0 / float(H) ** 0.5
    return dict(
        W_ih0=u(ks[0], (4 * H, I), b), W_hh0=u(ks[1], (4 * H, H), b),
        b_ih0=u(ks[2], (4 * H,), b), b_hh0=u(ks[3], (4 * H,), b),
        W_ih1=u(ks[4], (4 * H, H), b), W_hh1=u(ks[5], (4 * H, H), b),
        b_ih1=u(ks[6], (4 * H,), b), b_hh1=u(ks[7], (4 * H,), b),
        W1=u(ks[8], (H, H), b), bb1=u(ks[9], (H,), b),
        W2=u(ks[10], (H, H), b), bb2=u(ks[11], (H,), b),
        W3=u(ks[12], (1, H), b), bb3=u(ks[13], (1,), b),
    )


_GATE_PERM = jnp.array([1, 0, 3, 2])   # torch (i,f,g,o) -> kernel (f,i,o,g)


def _fuse_w(W):
    """Torch (4H, in) -> fused (in, 4H), gate order (f, i, o, g)."""
    H = HIDDEN
    Wg = W.reshape(4, H, -1)[_GATE_PERM]                  # (4, H, in)
    return jnp.transpose(Wg, (2, 0, 1)).reshape(-1, 4 * H)


def _fuse_b(b_ih, b_hh):
    H = HIDDEN
    return (b_ih + b_hh).reshape(4, H)[_GATE_PERM].reshape(1, 4 * H)


def pack_params(tp):
    bf16 = jnp.bfloat16
    wih0 = _fuse_w(tp["W_ih0"])                                   # (10, 256)
    wih0 = jnp.pad(wih0, ((0, IN_PAD - INPUT), (0, 0))).astype(bf16)  # (16,256)
    whh0 = _fuse_w(tp["W_hh0"])                                   # (64, 256) f32
    b0 = _fuse_b(tp["b_ih0"], tp["b_hh0"])                        # (1, 256)
    wih1 = _fuse_w(tp["W_ih1"]).astype(bf16)                      # (64, 256)
    whh1 = _fuse_w(tp["W_hh1"])                                   # (64, 256) f32
    b1 = _fuse_b(tp["b_ih1"], tp["b_hh1"])                        # (1, 256)
    rw1 = tp["W1"].T.astype(bf16)                                 # (64, 64)
    rb1 = tp["bb1"].reshape(1, HIDDEN)
    rw2 = tp["W2"].T.astype(bf16)
    rb2 = tp["bb2"].reshape(1, HIDDEN)
    fw = tp["W3"].reshape(1, HIDDEN)                              # f32 row (VPU)
    fb = tp["bb3"].reshape(1, 1)
    return (wih0, whh0, b0, wih1, whh1, b1, rw1, rb1, rw2, rb2, fw, fb)


# ---------------------------------------------------------------------------
# Wrapper
# ---------------------------------------------------------------------------

@functools.partial(jax.jit, static_argnums=(2,))
def _forward_jit(x_btf, params, block_b):
    B, T, I = x_btf.shape
    assert I == INPUT

    # Block sizing: fill the 256-wide MXU on v6e/v7x; force >=2 blocks when
    # there's enough work so both v7x TensorCores get one; size bb from B so
    # batch padding per block stays < 8 rows.  (On v5e prefer block_b=128.)
    Bp8 = _round_up(B, 8)
    n_blocks = max(pl.cdiv(Bp8, block_b), 1)
    if n_blocks == 1 and Bp8 >= 256:
        n_blocks = 2
    bb = _round_up(pl.cdiv(Bp8, n_blocks), 8)
    Bp = bb * n_blocks

    # Single fused transpose + pad (under jit this is one copy feeding the
    # kernel, not separate HBM round trips).
    x_tm = jnp.transpose(x_btf.astype(jnp.float32), (1, 0, 2))    # (T, B, 10)
    x_tm = jnp.pad(x_tm, ((0, 0), (0, Bp - B), (0, IN_PAD - INPUT)))

    def full_spec(a):
        return pl.BlockSpec(a.shape, lambda i: (0,) * a.ndim)

    out = pl.pallas_call(
        tte_kernel,
        out_shape=jax.ShapeDtypeStruct((n_blocks, 1, bb), jnp.float32),
        grid=(n_blocks,),
        in_specs=[pl.BlockSpec((T, bb, IN_PAD), lambda i: (0, i, 0))]
                 + [full_spec(w) for w in params],
        out_specs=pl.BlockSpec((1, 1, bb), lambda i: (i, 0, 0)),
        scratch_shapes=[pltpu.VMEM((T * bb, HIDDEN), jnp.bfloat16)],
        compiler_params=pltpu.CompilerParams(
            dimension_semantics=("parallel",)),   # shard batch blocks (v7x)
    )(x_tm, *params)

    return out.reshape(Bp)[:B][:, None]           # (B, 1), batch-first


def network_forward(x_btf, params, *, block_b=256):
    """x_btf: (B, T, 10) batch-first, like the PyTorch module."""
    return _forward_jit(x_btf, params, block_b)


# ---------------------------------------------------------------------------
# Pure-JAX f32 reference straight from the PyTorch-native parameter layout.
# ---------------------------------------------------------------------------

def reference(x_btf, tp):
    H = HIDDEN
    x = x_btf.astype(jnp.float32)
    B, T, _ = x.shape

    def lstm_layer(inp, W_ih, W_hh, b_ih, b_hh):
        h = jnp.zeros((B, H), jnp.float32)
        c = jnp.zeros((B, H), jnp.float32)
        outs = []
        for t in range(T):
            g = inp[:, t] @ W_ih.T + b_ih + h @ W_hh.T + b_hh
            i_g = jax.nn.sigmoid(g[:, :H])
            f_g = jax.nn.sigmoid(g[:, H:2 * H])
            g_g = jnp.tanh(g[:, 2 * H:3 * H])
            o_g = jax.nn.sigmoid(g[:, 3 * H:])
            c = f_g * c + i_g * g_g
            h = o_g * jnp.tanh(c)
            outs.append(h)
        return jnp.stack(outs, axis=1)

    h0_seq = lstm_layer(x, tp["W_ih0"], tp["W_hh0"], tp["b_ih0"], tp["b_hh0"])
    h1_seq = lstm_layer(h0_seq, tp["W_ih1"], tp["W_hh1"], tp["b_ih1"], tp["b_hh1"])
    r = h1_seq[:, -1]
    y = _leaky(r @ tp["W1"].T + tp["bb1"])
    y = _leaky(y @ tp["W2"].T + tp["bb2"])
    return _leaky((y + r) @ tp["W3"].T + tp["bb3"])


if __name__ == "__main__":
    key = jax.random.PRNGKey(0)
    kx, kp = jax.random.split(key)
    B, T = 8, 8
    x = jax.random.normal(kx, (B, T, INPUT), jnp.float32)   # (batch, seq, 10)

    torch_params = init_torch_params(kp)
    params = pack_params(torch_params)

    out = jax.block_until_ready(network_forward(x, params))
    assert out.shape == (B, 1), out.shape

    ref = reference(x, torch_params)
    # Tolerance accounts for bf16 operand rounding on the non-recurrent
    # matmuls (observed max abs error is ~1e-3); recurrent path stays f32.
    if not jnp.allclose(out, ref, atol=1e-2, rtol=1e-2):
        raise SystemExit(f"mismatch: max abs err {jnp.max(jnp.abs(out - ref))}")

    print("KERNEL_OK")
</pallas_src>

<mosaic_0001>
module attributes {stable_mosaic.version = 11 : i64} {
  func.func @tte_kernel(%arg0: i32, %arg1: memref<8x8x16xf32, #tpu.memory_space<vmem>>, %arg2: memref<16x256xbf16, #tpu.memory_space<vmem>>, %arg3: memref<64x256xf32, #tpu.memory_space<vmem>>, %arg4: memref<1x256xf32, #tpu.memory_space<vmem>>, %arg5: memref<64x256xbf16, #tpu.memory_space<vmem>>, %arg6: memref<64x256xf32, #tpu.memory_space<vmem>>, %arg7: memref<1x256xf32, #tpu.memory_space<vmem>>, %arg8: memref<64x64xbf16, #tpu.memory_space<vmem>>, %arg9: memref<1x64xf32, #tpu.memory_space<vmem>>, %arg10: memref<64x64xbf16, #tpu.memory_space<vmem>>, %arg11: memref<1x64xf32, #tpu.memory_space<vmem>>, %arg12: memref<1x64xf32, #tpu.memory_space<vmem>>, %arg13: memref<1x1xf32, #tpu.memory_space<vmem>>, %arg14: memref<1x1x8xf32, #tpu.memory_space<vmem>>, %arg15: memref<64x64xbf16, #tpu.memory_space<vmem>>) attributes {dimension_semantics = [#tpu.dimension_semantics<parallel>], iteration_bounds = array<i64: 1>, scalar_prefetch = 0 : i64, scratch_operands = 1 : i64, tpu.core_type = #tpu.core_type<tc>, window_params = [{transform_indices = @transform_0, window_bounds = array<i64: 8, 8, 16>}, {pipeline_mode = #tpu.pipeline_mode<synchronous>, transform_indices = @transform_1, window_bounds = array<i64: 16, 256>}, {pipeline_mode = #tpu.pipeline_mode<synchronous>, transform_indices = @transform_2, window_bounds = array<i64: 64, 256>}, {pipeline_mode = #tpu.pipeline_mode<synchronous>, transform_indices = @transform_3, window_bounds = array<i64: 1, 256>}, {pipeline_mode = #tpu.pipeline_mode<synchronous>, transform_indices = @transform_4, window_bounds = array<i64: 64, 256>}, {pipeline_mode = #tpu.pipeline_mode<synchronous>, transform_indices = @transform_5, window_bounds = array<i64: 64, 256>}, {pipeline_mode = #tpu.pipeline_mode<synchronous>, transform_indices = @transform_6, window_bounds = array<i64: 1, 256>}, {pipeline_mode = #tpu.pipeline_mode<synchronous>, transform_indices = @transform_7, window_bounds = array<i64: 64, 64>}, {pipeline_mode = #tpu.pipeline_mode<synchronous>, transform_indices = @transform_8, window_bounds = array<i64: 1, 64>}, {pipeline_mode = #tpu.pipeline_mode<synchronous>, transform_indices = @transform_9, window_bounds = array<i64: 64, 64>}, {pipeline_mode = #tpu.pipeline_mode<synchronous>, transform_indices = @transform_10, window_bounds = array<i64: 1, 64>}, {pipeline_mode = #tpu.pipeline_mode<synchronous>, transform_indices = @transform_11, window_bounds = array<i64: 1, 64>}, {pipeline_mode = #tpu.pipeline_mode<synchronous>, transform_indices = @transform_12, window_bounds = array<i64: 1, 1>}, {transform_indices = @transform_13, window_bounds = array<i64: 1, 1, 8>}]} {
    %c0 = arith.constant 0 : index
    %c0_0 = arith.constant 0 : index
    %c0_1 = arith.constant 0 : index
    %0 = vector.load %arg1[%c0, %c0_0, %c0_1] : memref<8x8x16xf32, #tpu.memory_space<vmem>>, vector<8x8x16xf32>
    %1 = vector.shape_cast %0 : vector<8x8x16xf32> to vector<64x16xf32>
    %2 = arith.truncf %1 : vector<64x16xf32> to vector<64x16xbf16>
    %c0_2 = arith.constant 0 : index
    %c0_3 = arith.constant 0 : index
    %3 = vector.load %arg2[%c0_2, %c0_3] : memref<16x256xbf16, #tpu.memory_space<vmem>>, vector<16x256xbf16>
    %cst = arith.constant dense<0.000000e+00> : vector<64x256xf32>
    %4 = tpu.matmul %2, %3, %cst {dimension_numbers = #tpu.dot_dimension_numbers<[1], [0], [0], [1], [0, 0, 1, 1], [], []>} : vector<64x16xbf16>, vector<16x256xbf16>, vector<64x256xf32> -> vector<64x256xf32>
    %c0_4 = arith.constant 0 : index
    %c0_5 = arith.constant 0 : index
    %5 = vector.load %arg4[%c0_4, %c0_5] : memref<1x256xf32, #tpu.memory_space<vmem>>, vector<1x256xf32>
    %6 = vector.broadcast %5 : vector<1x256xf32> to vector<64x256xf32>
    %7 = arith.addf %4, %6 : vector<64x256xf32>
    %cst_6 = arith.constant 0.000000e+00 : f32
    %8 = vector.broadcast %cst_6 : f32 to vector<8x64xf32>
    %cst_7 = arith.constant 0.000000e+00 : f32
    %9 = vector.broadcast %cst_7 : f32 to vector<8x64xf32>
    %10 = vector.extract_strided_slice %7 {offsets = [0, 0], sizes = [8, 256], strides = [1, 1]} : vector<64x256xf32> to vector<8x256xf32>
    %c0_8 = arith.constant 0 : index
    %c0_9 = arith.constant 0 : index
    %11 = vector.load %arg3[%c0_8, %c0_9] : memref<64x256xf32, #tpu.memory_space<vmem>>, vector<64x256xf32>
    %cst_10 = arith.constant dense<0.000000e+00> : vector<8x256xf32>
    %12 = tpu.matmul %8, %11, %cst_10 {dimension_numbers = #tpu.dot_dimension_numbers<[1], [0], [0], [1], [0, 0, 1, 1], [], []>} : vector<8x64xf32>, vector<64x256xf32>, vector<8x256xf32> -> vector<8x256xf32>
    %13 = arith.addf %10, %12 : vector<8x256xf32>
    %14 = vector.extract_strided_slice %13 {offsets = [0, 0], sizes = [8, 192], strides = [1, 1]} : vector<8x256xf32> to vector<8x192xf32>
    %15 = arith.negf %14 : vector<8x192xf32>
    %16 = math.exp %15 : vector<8x192xf32>
    %cst_11 = arith.constant 1.000000e+00 : f32
    %17 = vector.broadcast %cst_11 : f32 to vector<8x192xf32>
    %18 = arith.addf %17, %16 : vector<8x192xf32>
    %19 = arith.divf %17, %18 : vector<8x192xf32>
    %20 = vector.extract_strided_slice %13 {offsets = [0, 192], sizes = [8, 64], strides = [1, 1]} : vector<8x256xf32> to vector<8x64xf32>
    %21 = math.tanh %20 : vector<8x64xf32>
    %22 = vector.extract_strided_slice %19 {offsets = [0, 0], sizes = [8, 64], strides = [1, 1]} : vector<8x192xf32> to vector<8x64xf32>
    %23 = vector.extract_strided_slice %19 {offsets = [0, 64], sizes = [8, 64], strides = [1, 1]} : vector<8x192xf32> to vector<8x64xf32>
    %24 = vector.extract_strided_slice %19 {offsets = [0, 128], sizes = [8, 64], strides = [1, 1]} : vector<8x192xf32> to vector<8x64xf32>
    %25 = arith.mulf %22, %9 : vector<8x64xf32>
    %26 = arith.mulf %23, %21 : vector<8x64xf32>
    %27 = arith.addf %25, %26 : vector<8x64xf32>
    %28 = math.tanh %27 : vector<8x64xf32>
    %29 = arith.mulf %24, %28 : vector<8x64xf32>
    %30 = arith.truncf %29 : vector<8x64xf32> to vector<8x64xbf16>
    %c0_12 = arith.constant 0 : index
    %c0_13 = arith.constant 0 : index
    %31 = vector.load %arg15[%c0_12, %c0_13] : memref<64x64xbf16, #tpu.memory_space<vmem>>, vector<8x64xbf16>
    tpu.vector_store %arg15[%c0_12, %c0_13], %30 {strides = array<i32>} : memref<64x64xbf16, #tpu.memory_space<vmem>>, vector<8x64xbf16>,
    %32 = vector.extract_strided_slice %7 {offsets = [8, 0], sizes = [8, 256], strides = [1, 1]} : vector<64x256xf32> to vector<8x256xf32>
    %c0_14 = arith.constant 0 : index
    %c0_15 = arith.constant 0 : index
    %33 = vector.load %arg3[%c0_14, %c0_15] : memref<64x256xf32, #tpu.memory_space<vmem>>, vector<64x256xf32>
    %cst_16 = arith.constant dense<0.000000e+00> : vector<8x256xf32>
    %34 = tpu.matmul %29, %33, %cst_16 {dimension_numbers = #tpu.dot_dimension_numbers<[1], [0], [0], [1], [0, 0, 1, 1], [], []>} : vector<8x64xf32>, vector<64x256xf32>, vector<8x256xf32> -> vector<8x256xf32>
    %35 = arith.addf %32, %34 : vector<8x256xf32>
    %36 = vector.extract_strided_slice %35 {offsets = [0, 0], sizes = [8, 192], strides = [1, 1]} : vector<8x256xf32> to vector<8x192xf32>
    %37 = arith.negf %36 : vector<8x192xf32>
    %38 = math.exp %37 : vector<8x192xf32>
    %cst_17 = arith.constant 1.000000e+00 : f32
    %39 = vector.broadcast %cst_17 : f32 to vector<8x192xf32>
    %40 = arith.addf %39, %38 : vector<8x192xf32>
    %41 = arith.divf %39, %40 : vector<8x192xf32>
    %42 = vector.extract_strided_slice %35 {offsets = [0, 192], sizes = [8, 64], strides = [1, 1]} : vector<8x256xf32> to vector<8x64xf32>
    %43 = math.tanh %42 : vector<8x64xf32>
    %44 = vector.extract_strided_slice %41 {offsets = [0, 0], sizes = [8, 64], strides = [1, 1]} : vector<8x192xf32> to vector<8x64xf32>
    %45 = vector.extract_strided_slice %41 {offsets = [0, 64], sizes = [8, 64], strides = [1, 1]} : vector<8x192xf32> to vector<8x64xf32>
    %46 = vector.extract_strided_slice %41 {offsets = [0, 128], sizes = [8, 64], strides = [1, 1]} : vector<8x192xf32> to vector<8x64xf32>
    %47 = arith.mulf %44, %27 : vector<8x64xf32>
    %48 = arith.mulf %45, %43 : vector<8x64xf32>
    %49 = arith.addf %47, %48 : vector<8x64xf32>
    %50 = math.tanh %49 : vector<8x64xf32>
    %51 = arith.mulf %46, %50 : vector<8x64xf32>
    %52 = arith.truncf %51 : vector<8x64xf32> to vector<8x64xbf16>
    %c8 = arith.constant 8 : index
    %c0_18 = arith.constant 0 : index
    %53 = vector.load %arg15[%c8, %c0_18] : memref<64x64xbf16, #tpu.memory_space<vmem>>, vector<8x64xbf16>
    tpu.vector_store %arg15[%c8, %c0_18], %52 {strides = array<i32>} : memref<64x64xbf16, #tpu.memory_space<vmem>>, vector<8x64xbf16>,
    %54 = vector.extract_strided_slice %7 {offsets = [16, 0], sizes = [8, 256], strides = [1, 1]} : vector<64x256xf32> to vector<8x256xf32>
    %c0_19 = arith.constant 0 : index
    %c0_20 = arith.constant 0 : index
    %55 = vector.load %arg3[%c0_19, %c0_20] : memref<64x256xf32, #tpu.memory_space<vmem>>, vector<64x256xf32>
    %cst_21 = arith.constant dense<0.000000e+00> : vector<8x256xf32>
    %56 = tpu.matmul %51, %55, %cst_21 {dimension_numbers = #tpu.dot_dimension_numbers<[1], [0], [0], [1], [0, 0, 1, 1], [], []>} : vector<8x64xf32>, vector<64x256xf32>, vector<8x256xf32> -> vector<8x256xf32>
    %57 = arith.addf %54, %56 : vector<8x256xf32>
    %58 = vector.extract_strided_slice %57 {offsets = [0, 0], sizes = [8, 192], strides = [1, 1]} : vector<8x256xf32> to vector<8x192xf32>
    %59 = arith.negf %58 : vector<8x192xf32>
    %60 = math.exp %59 : vector<8x192xf32>
    %cst_22 = arith.constant 1.000000e+00 : f32
    %61 = vector.broadcast %cst_22 : f32 to vector<8x192xf32>
    %62 = arith.addf %61, %60 : vector<8x192xf32>
    %63 = arith.divf %61, %62 : vector<8x192xf32>
    %64 = vector.extract_strided_slice %57 {offsets = [0, 192], sizes = [8, 64], strides = [1, 1]} : vector<8x256xf32> to vector<8x64xf32>
    %65 = math.tanh %64 : vector<8x64xf32>
    %66 = vector.extract_strided_slice %63 {offsets = [0, 0], sizes = [8, 64], strides = [1, 1]} : vector<8x192xf32> to vector<8x64xf32>
    %67 = vector.extract_strided_slice %63 {offsets = [0, 64], sizes = [8, 64], strides = [1, 1]} : vector<8x192xf32> to vector<8x64xf32>
    %68 = vector.extract_strided_slice %63 {offsets = [0, 128], sizes = [8, 64], strides = [1, 1]} : vector<8x192xf32> to vector<8x64xf32>
    %69 = arith.mulf %66, %49 : vector<8x64xf32>
    %70 = arith.mulf %67, %65 : vector<8x64xf32>
    %71 = arith.addf %69, %70 : vector<8x64xf32>
    %72 = math.tanh %71 : vector<8x64xf32>
    %73 = arith.mulf %68, %72 : vector<8x64xf32>
    %74 = arith.truncf %73 : vector<8x64xf32> to vector<8x64xbf16>
    %c16 = arith.constant 16 : index
    %c0_23 = arith.constant 0 : index
    %75 = vector.load %arg15[%c16, %c0_23] : memref<64x64xbf16, #tpu.memory_space<vmem>>, vector<8x64xbf16>
    tpu.vector_store %arg15[%c16, %c0_23], %74 {strides = array<i32>} : memref<64x64xbf16, #tpu.memory_space<vmem>>, vector<8x64xbf16>,
    %76 = vector.extract_strided_slice %7 {offsets = [24, 0], sizes = [8, 256], strides = [1, 1]} : vector<64x256xf32> to vector<8x256xf32>
    %c0_24 = arith.constant 0 : index
    %c0_25 = arith.constant 0 : index
    %77 = vector.load %arg3[%c0_24, %c0_25] : memref<64x256xf32, #tpu.memory_space<vmem>>, vector<64x256xf32>
    %cst_26 = arith.constant dense<0.000000e+00> : vector<8x256xf32>
    %78 = tpu.matmul %73, %77, %cst_26 {dimension_numbers = #tpu.dot_dimension_numbers<[1], [0], [0], [1], [0, 0, 1, 1], [], []>} : vector<8x64xf32>, vector<64x256xf32>, vector<8x256xf32> -> vector<8x256xf32>
    %79 = arith.addf %76, %78 : vector<8x256xf32>
    %80 = vector.extract_strided_slice %79 {offsets = [0, 0], sizes = [8, 192], strides = [1, 1]} : vector<8x256xf32> to vector<8x192xf32>
    %81 = arith.negf %80 : vector<8x192xf32>
    %82 = math.exp %81 : vector<8x192xf32>
    %cst_27 = arith.constant 1.000000e+00 : f32
    %83 = vector.broadcast %cst_27 : f32 to vector<8x192xf32>
    %84 = arith.addf %83, %82 : vector<8x192xf32>
    %85 = arith.divf %83, %84 : vector<8x192xf32>
    %86 = vector.extract_strided_slice %79 {offsets = [0, 192], sizes = [8, 64], strides = [1, 1]} : vector<8x256xf32> to vector<8x64xf32>
    %87 = math.tanh %86 : vector<8x64xf32>
    %88 = vector.extract_strided_slice %85 {offsets = [0, 0], sizes = [8, 64], strides = [1, 1]} : vector<8x192xf32> to vector<8x64xf32>
    %89 = vector.extract_strided_slice %85 {offsets = [0, 64], sizes = [8, 64], strides = [1, 1]} : vector<8x192xf32> to vector<8x64xf32>
    %90 = vector.extract_strided_slice %85 {offsets = [0, 128], sizes = [8, 64], strides = [1, 1]} : vector<8x192xf32> to vector<8x64xf32>
    %91 = arith.mulf %88, %71 : vector<8x64xf32>
    %92 = arith.mulf %89, %87 : vector<8x64xf32>
    %93 = arith.addf %91, %92 : vector<8x64xf32>
    %94 = math.tanh %93 : vector<8x64xf32>
    %95 = arith.mulf %90, %94 : vector<8x64xf32>
    %96 = arith.truncf %95 : vector<8x64xf32> to vector<8x64xbf16>
    %c24 = arith.constant 24 : index
    %c0_28 = arith.constant 0 : index
    %97 = vector.load %arg15[%c24, %c0_28] : memref<64x64xbf16, #tpu.memory_space<vmem>>, vector<8x64xbf16>
    tpu.vector_store %arg15[%c24, %c0_28], %96 {strides = array<i32>} : memref<64x64xbf16, #tpu.memory_space<vmem>>, vector<8x64xbf16>,
    %98 = vector.extract_strided_slice %7 {offsets = [32, 0], sizes = [8, 256], strides = [1, 1]} : vector<64x256xf32> to vector<8x256xf32>
    %c0_29 = arith.constant 0 : index
    %c0_30 = arith.constant 0 : index
    %99 = vector.load %arg3[%c0_29, %c0_30] : memref<64x256xf32, #tpu.memory_space<vmem>>, vector<64x256xf32>
    %cst_31 = arith.constant dense<0.000000e+00> : vector<8x256xf32>
    %100 = tpu.matmul %95, %99, %cst_31 {dimension_numbers = #tpu.dot_dimension_numbers<[1], [0], [0], [1], [0, 0, 1, 1], [], []>} : vector<8x64xf32>, vector<64x256xf32>, vector<8x256xf32> -> vector<8x256xf32>
    %101 = arith.addf %98, %100 : vector<8x256xf32>
    %102 = vector.extract_strided_slice %101 {offsets = [0, 0], sizes = [8, 192], strides = [1, 1]} : vector<8x256xf32> to vector<8x192xf32>
    %103 = arith.negf %102 : vector<8x192xf32>
    %104 = math.exp %103 : vector<8x192xf32>
    %cst_32 = arith.constant 1.000000e+00 : f32
    %105 = vector.broadcast %cst_32 : f32 to vector<8x192xf32>
    %106 = arith.addf %105, %104 : vector<8x192xf32>
    %107 = arith.divf %105, %106 : vector<8x192xf32>
    %108 = vector.extract_strided_slice %101 {offsets = [0, 192], sizes = [8, 64], strides = [1, 1]} : vector<8x256xf32> to vector<8x64xf32>
    %109 = math.tanh %108 : vector<8x64xf32>
    %110 = vector.extract_strided_slice %107 {offsets = [0, 0], sizes = [8, 64], strides = [1, 1]} : vector<8x192xf32> to vector<8x64xf32>
    %111 = vector.extract_strided_slice %107 {offsets = [0, 64], sizes = [8, 64], strides = [1, 1]} : vector<8x192xf32> to vector<8x64xf32>
    %112 = vector.extract_strided_slice %107 {offsets = [0, 128], sizes = [8, 64], strides = [1, 1]} : vector<8x192xf32> to vector<8x64xf32>
    %113 = arith.mulf %110, %93 : vector<8x64xf32>
    %114 = arith.mulf %111, %109 : vector<8x64xf32>
    %115 = arith.addf %113, %114 : vector<8x64xf32>
    %116 = math.tanh %115 : vector<8x64xf32>
    %117 = arith.mulf %112, %116 : vector<8x64xf32>
    %118 = arith.truncf %117 : vector<8x64xf32> to vector<8x64xbf16>
    %c32 = arith.constant 32 : index
    %c0_33 = arith.constant 0 : index
    %119 = vector.load %arg15[%c32, %c0_33] : memref<64x64xbf16, #tpu.memory_space<vmem>>, vector<8x64xbf16>
    tpu.vector_store %arg15[%c32, %c0_33], %118 {strides = array<i32>} : memref<64x64xbf16, #tpu.memory_space<vmem>>, vector<8x64xbf16>,
    %120 = vector.extract_strided_slice %7 {offsets = [40, 0], sizes = [8, 256], strides = [1, 1]} : vector<64x256xf32> to vector<8x256xf32>
    %c0_34 = arith.constant 0 : index
    %c0_35 = arith.constant 0 : index
    %121 = vector.load %arg3[%c0_34, %c0_35] : memref<64x256xf32, #tpu.memory_space<vmem>>, vector<64x256xf32>
    %cst_36 = arith.constant dense<0.000000e+00> : vector<8x256xf32>
    %122 = tpu.matmul %117, %121, %cst_36 {dimension_numbers = #tpu.dot_dimension_numbers<[1], [0], [0], [1], [0, 0, 1, 1], [], []>} : vector<8x64xf32>, vector<64x256xf32>, vector<8x256xf32> -> vector<8x256xf32>
    %123 = arith.addf %120, %122 : vector<8x256xf32>
    %124 = vector.extract_strided_slice %123 {offsets = [0, 0], sizes = [8, 192], strides = [1, 1]} : vector<8x256xf32> to vector<8x192xf32>
    %125 = arith.negf %124 : vector<8x192xf32>
    %126 = math.exp %125 : vector<8x192xf32>
    %cst_37 = arith.constant 1.000000e+00 : f32
    %127 = vector.broadcast %cst_37 : f32 to vector<8x192xf32>
    %128 = arith.addf %127, %126 : vector<8x192xf32>
    %129 = arith.divf %127, %128 : vector<8x192xf32>
    %130 = vector.extract_strided_slice %123 {offsets = [0, 192], sizes = [8, 64], strides = [1, 1]} : vector<8x256xf32> to vector<8x64xf32>
    %131 = math.tanh %130 : vector<8x64xf32>
    %132 = vector.extract_strided_slice %129 {offsets = [0, 0], sizes = [8, 64], strides = [1, 1]} : vector<8x192xf32> to vector<8x64xf32>
    %133 = vector.extract_strided_slice %129 {offsets = [0, 64], sizes = [8, 64], strides = [1, 1]} : vector<8x192xf32> to vector<8x64xf32>
    %134 = vector.extract_strided_slice %129 {offsets = [0, 128], sizes = [8, 64], strides = [1, 1]} : vector<8x192xf32> to vector<8x64xf32>
    %135 = arith.mulf %132, %115 : vector<8x64xf32>
    %136 = arith.mulf %133, %131 : vector<8x64xf32>
    %137 = arith.addf %135, %136 : vector<8x64xf32>
    %138 = math.tanh %137 : vector<8x64xf32>
    %139 = arith.mulf %134, %138 : vector<8x64xf32>
    %140 = arith.truncf %139 : vector<8x64xf32> to vector<8x64xbf16>
    %c40 = arith.constant 40 : index
    %c0_38 = arith.constant 0 : index
    %141 = vector.load %arg15[%c40, %c0_38] : memref<64x64xbf16, #tpu.memory_space<vmem>>, vector<8x64xbf16>
    tpu.vector_store %arg15[%c40, %c0_38], %140 {strides = array<i32>} : memref<64x64xbf16, #tpu.memory_space<vmem>>, vector<8x64xbf16>,
    %142 = vector.extract_strided_slice %7 {offsets = [48, 0], sizes = [8, 256], strides = [1, 1]} : vector<64x256xf32> to vector<8x256xf32>
    %c0_39 = arith.constant 0 : index
    %c0_40 = arith.constant 0 : index
    %143 = vector.load %arg3[%c0_39, %c0_40] : memref<64x256xf32, #tpu.memory_space<vmem>>, vector<64x256xf32>
    %cst_41 = arith.constant dense<0.000000e+00> : vector<8x256xf32>
    %144 = tpu.matmul %139, %143, %cst_41 {dimension_numbers = #tpu.dot_dimension_numbers<[1], [0], [0], [1], [0, 0, 1, 1], [], []>} : vector<8x64xf32>, vector<64x256xf32>, vector<8x256xf32> -> vector<8x256xf32>
    %145 = arith.addf %142, %144 : vector<8x256xf32>
    %146 = vector.extract_strided_slice %145 {offsets = [0, 0], sizes = [8, 192], strides = [1, 1]} : vector<8x256xf32> to vector<8x192xf32>
    %147 = arith.negf %146 : vector<8x192xf32>
    %148 = math.exp %147 : vector<8x192xf32>
    %cst_42 = arith.constant 1.000000e+00 : f32
    %149 = vector.broadcast %cst_42 : f32 to vector<8x192xf32>
    %150 = arith.addf %149, %148 : vector<8x192xf32>
    %151 = arith.divf %149, %150 : vector<8x192xf32>
    %152 = vector.extract_strided_slice %145 {offsets = [0, 192], sizes = [8, 64], strides = [1, 1]} : vector<8x256xf32> to vector<8x64xf32>
    %153 = math.tanh %152 : vector<8x64xf32>
    %154 = vector.extract_strided_slice %151 {offsets = [0, 0], sizes = [8, 64], strides = [1, 1]} : vector<8x192xf32> to vector<8x64xf32>
    %155 = vector.extract_strided_slice %151 {offsets = [0, 64], sizes = [8, 64], strides = [1, 1]} : vector<8x192xf32> to vector<8x64xf32>
    %156 = vector.extract_strided_slice %151 {offsets = [0, 128], sizes = [8, 64], strides = [1, 1]} : vector<8x192xf32> to vector<8x64xf32>
    %157 = arith.mulf %154, %137 : vector<8x64xf32>
    %158 = arith.mulf %155, %153 : vector<8x64xf32>
    %159 = arith.addf %157, %158 : vector<8x64xf32>
    %160 = math.tanh %159 : vector<8x64xf32>
    %161 = arith.mulf %156, %160 : vector<8x64xf32>
    %162 = arith.truncf %161 : vector<8x64xf32> to vector<8x64xbf16>
    %c48 = arith.constant 48 : index
    %c0_43 = arith.constant 0 : index
    %163 = vector.load %arg15[%c48, %c0_43] : memref<64x64xbf16, #tpu.memory_space<vmem>>, vector<8x64xbf16>
    tpu.vector_store %arg15[%c48, %c0_43], %162 {strides = array<i32>} : memref<64x64xbf16, #tpu.memory_space<vmem>>, vector<8x64xbf16>,
    %164 = vector.extract_strided_slice %7 {offsets = [56, 0], sizes = [8, 256], strides = [1, 1]} : vector<64x256xf32> to vector<8x256xf32>
    %c0_44 = arith.constant 0 : index
    %c0_45 = arith.constant 0 : index
    %165 = vector.load %arg3[%c0_44, %c0_45] : memref<64x256xf32, #tpu.memory_space<vmem>>, vector<64x256xf32>
    %cst_46 = arith.constant dense<0.000000e+00> : vector<8x256xf32>
    %166 = tpu.matmul %161, %165, %cst_46 {dimension_numbers = #tpu.dot_dimension_numbers<[1], [0], [0], [1], [0, 0, 1, 1], [], []>} : vector<8x64xf32>, vector<64x256xf32>, vector<8x256xf32> -> vector<8x256xf32>
    %167 = arith.addf %164, %166 : vector<8x256xf32>
    %168 = vector.extract_strided_slice %167 {offsets = [0, 0], sizes = [8, 192], strides = [1, 1]} : vector<8x256xf32> to vector<8x192xf32>
    %169 = arith.negf %168 : vector<8x192xf32>
    %170 = math.exp %169 : vector<8x192xf32>
    %cst_47 = arith.constant 1.000000e+00 : f32
    %171 = vector.broadcast %cst_47 : f32 to vector<8x192xf32>
    %172 = arith.addf %171, %170 : vector<8x192xf32>
    %173 = arith.divf %171, %172 : vector<8x192xf32>
    %174 = vector.extract_strided_slice %167 {offsets = [0, 192], sizes = [8, 64], strides = [1, 1]} : vector<8x256xf32> to vector<8x64xf32>
    %175 = math.tanh %174 : vector<8x64xf32>
    %176 = vector.extract_strided_slice %173 {offsets = [0, 0], sizes = [8, 64], strides = [1, 1]} : vector<8x192xf32> to vector<8x64xf32>
    %177 = vector.extract_strided_slice %173 {offsets = [0, 64], sizes = [8, 64], strides = [1, 1]} : vector<8x192xf32> to vector<8x64xf32>
    %178 = vector.extract_strided_slice %173 {offsets = [0, 128], sizes = [8, 64], strides = [1, 1]} : vector<8x192xf32> to vector<8x64xf32>
    %179 = arith.mulf %176, %159 : vector<8x64xf32>
    %180 = arith.mulf %177, %175 : vector<8x64xf32>
    %181 = arith.addf %179, %180 : vector<8x64xf32>
    %182 = math.tanh %181 : vector<8x64xf32>
    %183 = arith.mulf %178, %182 : vector<8x64xf32>
    %184 = arith.truncf %183 : vector<8x64xf32> to vector<8x64xbf16>
    %c56 = arith.constant 56 : index
    %c0_48 = arith.constant 0 : index
    %185 = vector.load %arg15[%c56, %c0_48] : memref<64x64xbf16, #tpu.memory_space<vmem>>, vector<8x64xbf16>
    tpu.vector_store %arg15[%c56, %c0_48], %184 {strides = array<i32>} : memref<64x64xbf16, #tpu.memory_space<vmem>>, vector<8x64xbf16>,
    %c0_49 = arith.constant 0 : index
    %c0_50 = arith.constant 0 : index
    %186 = vector.load %arg15[%c0_49, %c0_50] : memref<64x64xbf16, #tpu.memory_space<vmem>>, vector<64x64xbf16>
    %c0_51 = arith.constant 0 : index
    %c0_52 = arith.constant 0 : index
    %187 = vector.load %arg5[%c0_51, %c0_52] : memref<64x256xbf16, #tpu.memory_space<vmem>>, vector<64x256xbf16>
    %cst_53 = arith.constant dense<0.000000e+00> : vector<64x256xf32>
    %188 = tpu.matmul %186, %187, %cst_53 {dimension_numbers = #tpu.dot_dimension_numbers<[1], [0], [0], [1], [0, 0, 1, 1], [], []>} : vector<64x64xbf16>, vector<64x256xbf16>, vector<64x256xf32> -> vector<64x256xf32>
    %c0_54 = arith.constant 0 : index
    %c0_55 = arith.constant 0 : index
    %189 = vector.load %arg7[%c0_54, %c0_55] : memref<1x256xf32, #tpu.memory_space<vmem>>, vector<1x256xf32>
    %190 = vector.broadcast %189 : vector<1x256xf32> to vector<64x256xf32>
    %191 = arith.addf %188, %190 : vector<64x256xf32>
    %cst_56 = arith.constant 0.000000e+00 : f32
    %192 = vector.broadcast %cst_56 : f32 to vector<8x64xf32>
    %cst_57 = arith.constant 0.000000e+00 : f32
    %193 = vector.broadcast %cst_57 : f32 to vector<8x64xf32>
    %194 = vector.extract_strided_slice %191 {offsets = [0, 0], sizes = [8, 256], strides = [1, 1]} : vector<64x256xf32> to vector<8x256xf32>
    %c0_58 = arith.constant 0 : index
    %c0_59 = arith.constant 0 : index
    %195 = vector.load %arg6[%c0_58, %c0_59] : memref<64x256xf32, #tpu.memory_space<vmem>>, vector<64x256xf32>
    %cst_60 = arith.constant dense<0.000000e+00> : vector<8x256xf32>
    %196 = tpu.matmul %192, %195, %cst_60 {dimension_numbers = #tpu.dot_dimension_numbers<[1], [0], [0], [1], [0, 0, 1, 1], [], []>} : vector<8x64xf32>, vector<64x256xf32>, vector<8x256xf32> -> vector<8x256xf32>
    %197 = arith.addf %194, %196 : vector<8x256xf32>
    %198 = vector.extract_strided_slice %197 {offsets = [0, 0], sizes = [8, 192], strides = [1, 1]} : vector<8x256xf32> to vector<8x192xf32>
    %199 = arith.negf %198 : vector<8x192xf32>
    %200 = math.exp %199 : vector<8x192xf32>
    %cst_61 = arith.constant 1.000000e+00 : f32
    %201 = vector.broadcast %cst_61 : f32 to vector<8x192xf32>
    %202 = arith.addf %201, %200 : vector<8x192xf32>
    %203 = arith.divf %201, %202 : vector<8x192xf32>
    %204 = vector.extract_strided_slice %197 {offsets = [0, 192], sizes = [8, 64], strides = [1, 1]} : vector<8x256xf32> to vector<8x64xf32>
    %205 = math.tanh %204 : vector<8x64xf32>
    %206 = vector.extract_strided_slice %203 {offsets = [0, 0], sizes = [8, 64], strides = [1, 1]} : vector<8x192xf32> to vector<8x64xf32>
    %207 = vector.extract_strided_slice %203 {offsets = [0, 64], sizes = [8, 64], strides = [1, 1]} : vector<8x192xf32> to vector<8x64xf32>
    %208 = vector.extract_strided_slice %203 {offsets = [0, 128], sizes = [8, 64], strides = [1, 1]} : vector<8x192xf32> to vector<8x64xf32>
    %209 = arith.mulf %206, %193 : vector<8x64xf32>
    %210 = arith.mulf %207, %205 : vector<8x64xf32>
    %211 = arith.addf %209, %210 : vector<8x64xf32>
    %212 = math.tanh %211 : vector<8x64xf32>
    %213 = arith.mulf %208, %212 : vector<8x64xf32>
    %214 = vector.extract_strided_slice %191 {offsets = [8, 0], sizes = [8, 256], strides = [1, 1]} : vector<64x256xf32> to vector<8x256xf32>
    %c0_62 = arith.constant 0 : index
    %c0_63 = arith.constant 0 : index
    %215 = vector.load %arg6[%c0_62, %c0_63] : memref<64x256xf32, #tpu.memory_space<vmem>>, vector<64x256xf32>
    %cst_64 = arith.constant dense<0.000000e+00> : vector<8x256xf32>
    %216 = tpu.matmul %213, %215, %cst_64 {dimension_numbers = #tpu.dot_dimension_numbers<[1], [0], [0], [1], [0, 0, 1, 1], [], []>} : vector<8x64xf32>, vector<64x256xf32>, vector<8x256xf32> -> vector<8x256xf32>
    %217 = arith.addf %214, %216 : vector<8x256xf32>
    %218 = vector.extract_strided_slice %217 {offsets = [0, 0], sizes = [8, 192], strides = [1, 1]} : vector<8x256xf32> to vector<8x192xf32>
    %219 = arith.negf %218 : vector<8x192xf32>
    %220 = math.exp %219 : vector<8x192xf32>
    %cst_65 = arith.constant 1.000000e+00 : f32
    %221 = vector.broadcast %cst_65 : f32 to vector<8x192xf32>
    %222 = arith.addf %221, %220 : vector<8x192xf32>
    %223 = arith.divf %221, %222 : vector<8x192xf32>
    %224 = vector.extract_strided_slice %217 {offsets = [0, 192], sizes = [8, 64], strides = [1, 1]} : vector<8x256xf32> to vector<8x64xf32>
    %225 = math.tanh %224 : vector<8x64xf32>
    %226 = vector.extract_strided_slice %223 {offsets = [0, 0], sizes = [8, 64], strides = [1, 1]} : vector<8x192xf32> to vector<8x64xf32>
    %227 = vector.extract_strided_slice %223 {offsets = [0, 64], sizes = [8, 64], strides = [1, 1]} : vector<8x192xf32> to vector<8x64xf32>
    %228 = vector.extract_strided_slice %223 {offsets = [0, 128], sizes = [8, 64], strides = [1, 1]} : vector<8x192xf32> to vector<8x64xf32>
    %229 = arith.mulf %226, %211 : vector<8x64xf32>
    %230 = arith.mulf %227, %225 : vector<8x64xf32>
    %231 = arith.addf %229, %230 : vector<8x64xf32>
    %232 = math.tanh %231 : vector<8x64xf32>
    %233 = arith.mulf %228, %232 : vector<8x64xf32>
    %234 = vector.extract_strided_slice %191 {offsets = [16, 0], sizes = [8, 256], strides = [1, 1]} : vector<64x256xf32> to vector<8x256xf32>
    %c0_66 = arith.constant 0 : index
    %c0_67 = arith.constant 0 : index
    %235 = vector.load %arg6[%c0_66, %c0_67] : memref<64x256xf32, #tpu.memory_space<vmem>>, vector<64x256xf32>
    %cst_68 = arith.constant dense<0.000000e+00> : vector<8x256xf32>
    %236 = tpu.matmul %233, %235, %cst_68 {dimension_numbers = #tpu.dot_dimension_numbers<[1], [0], [0], [1], [0, 0, 1, 1], [], []>} : vector<8x64xf32>, vector<64x256xf32>, vector<8x256xf32> -> vector<8x256xf32>
    %237 = arith.addf %234, %236 : vector<8x256xf32>
    %238 = vector.extract_strided_slice %237 {offsets = [0, 0], sizes = [8, 192], strides = [1, 1]} : vector<8x256xf32> to vector<8x192xf32>
    %239 = arith.negf %238 : vector<8x192xf32>
    %240 = math.exp %239 : vector<8x192xf32>
    %cst_69 = arith.constant 1.000000e+00 : f32
    %241 = vector.broadcast %cst_69 : f32 to vector<8x192xf32>
    %242 = arith.addf %241, %240 : vector<8x192xf32>
    %243 = arith.divf %241, %242 : vector<8x192xf32>
    %244 = vector.extract_strided_slice %237 {offsets = [0, 192], sizes = [8, 64], strides = [1, 1]} : vector<8x256xf32> to vector<8x64xf32>
    %245 = math.tanh %244 : vector<8x64xf32>
    %246 = vector.extract_strided_slice %243 {offsets = [0, 0], sizes = [8, 64], strides = [1, 1]} : vector<8x192xf32> to vector<8x64xf32>
    %247 = vector.extract_strided_slice %243 {offsets = [0, 64], sizes = [8, 64], strides = [1, 1]} : vector<8x192xf32> to vector<8x64xf32>
    %248 = vector.extract_strided_slice %243 {offsets = [0, 128], sizes = [8, 64], strides = [1, 1]} : vector<8x192xf32> to vector<8x64xf32>
    %249 = arith.mulf %246, %231 : vector<8x64xf32>
    %250 = arith.mulf %247, %245 : vector<8x64xf32>
    %251 = arith.addf %249, %250 : vector<8x64xf32>
    %252 = math.tanh %251 : vector<8x64xf32>
    %253 = arith.mulf %248, %252 : vector<8x64xf32>
    %254 = vector.extract_strided_slice %191 {offsets = [24, 0], sizes = [8, 256], strides = [1, 1]} : vector<64x256xf32> to vector<8x256xf32>
    %c0_70 = arith.constant 0 : index
    %c0_71 = arith.constant 0 : index
    %255 = vector.load %arg6[%c0_70, %c0_71] : memref<64x256xf32, #tpu.memory_space<vmem>>, vector<64x256xf32>
    %cst_72 = arith.constant dense<0.000000e+00> : vector<8x256xf32>
    %256 = tpu.matmul %253, %255, %cst_72 {dimension_numbers = #tpu.dot_dimension_numbers<[1], [0], [0], [1], [0, 0, 1, 1], [], []>} : vector<8x64xf32>, vector<64x256xf32>, vector<8x256xf32> -> vector<8x256xf32>
    %257 = arith.addf %254, %256 : vector<8x256xf32>
    %258 = vector.extract_strided_slice %257 {offsets = [0, 0], sizes = [8, 192], strides = [1, 1]} : vector<8x256xf32> to vector<8x192xf32>
    %259 = arith.negf %258 : vector<8x192xf32>
    %260 = math.exp %259 : vector<8x192xf32>
    %cst_73 = arith.constant 1.000000e+00 : f32
    %261 = vector.broadcast %cst_73 : f32 to vector<8x192xf32>
    %262 = arith.addf %261, %260 : vector<8x192xf32>
    %263 = arith.divf %261, %262 : vector<8x192xf32>
    %264 = vector.extract_strided_slice %257 {offsets = [0, 192], sizes = [8, 64], strides = [1, 1]} : vector<8x256xf32> to vector<8x64xf32>
    %265 = math.tanh %264 : vector<8x64xf32>
    %266 = vector.extract_strided_slice %263 {offsets = [0, 0], sizes = [8, 64], strides = [1, 1]} : vector<8x192xf32> to vector<8x64xf32>
    %267 = vector.extract_strided_slice %263 {offsets = [0, 64], sizes = [8, 64], strides = [1, 1]} : vector<8x192xf32> to vector<8x64xf32>
    %268 = vector.extract_strided_slice %263 {offsets = [0, 128], sizes = [8, 64], strides = [1, 1]} : vector<8x192xf32> to vector<8x64xf32>
    %269 = arith.mulf %266, %251 : vector<8x64xf32>
    %270 = arith.mulf %267, %265 : vector<8x64xf32>
    %271 = arith.addf %269, %270 : vector<8x64xf32>
    %272 = math.tanh %271 : vector<8x64xf32>
    %273 = arith.mulf %268, %272 : vector<8x64xf32>
    %274 = vector.extract_strided_slice %191 {offsets = [32, 0], sizes = [8, 256], strides = [1, 1]} : vector<64x256xf32> to vector<8x256xf32>
    %c0_74 = arith.constant 0 : index
    %c0_75 = arith.constant 0 : index
    %275 = vector.load %arg6[%c0_74, %c0_75] : memref<64x256xf32, #tpu.memory_space<vmem>>, vector<64x256xf32>
    %cst_76 = arith.constant dense<0.000000e+00> : vector<8x256xf32>
    %276 = tpu.matmul %273, %275, %cst_76 {dimension_numbers = #tpu.dot_dimension_numbers<[1], [0], [0], [1], [0, 0, 1, 1], [], []>} : vector<8x64xf32>, vector<64x256xf32>, vector<8x256xf32> -> vector<8x256xf32>
    %277 = arith.addf %274, %276 : vector<8x256xf32>
    %278 = vector.extract_strided_slice %277 {offsets = [0, 0], sizes = [8, 192], strides = [1, 1]} : vector<8x256xf32> to vector<8x192xf32>
    %279 = arith.negf %278 : vector<8x192xf32>
    %280 = math.exp %279 : vector<8x192xf32>
    %cst_77 = arith.constant 1.000000e+00 : f32
    %281 = vector.broadcast %cst_77 : f32 to vector<8x192xf32>
    %282 = arith.addf %281, %280 : vector<8x192xf32>
    %283 = arith.divf %281, %282 : vector<8x192xf32>
    %284 = vector.extract_strided_slice %277 {offsets = [0, 192], sizes = [8, 64], strides = [1, 1]} : vector<8x256xf32> to vector<8x64xf32>
    %285 = math.tanh %284 : vector<8x64xf32>
    %286 = vector.extract_strided_slice %283 {offsets = [0, 0], sizes = [8, 64], strides = [1, 1]} : vector<8x192xf32> to vector<8x64xf32>
    %287 = vector.extract_strided_slice %283 {offsets = [0, 64], sizes = [8, 64], strides = [1, 1]} : vector<8x192xf32> to vector<8x64xf32>
    %288 = vector.extract_strided_slice %283 {offsets = [0, 128], sizes = [8, 64], strides = [1, 1]} : vector<8x192xf32> to vector<8x64xf32>
    %289 = arith.mulf %286, %271 : vector<8x64xf32>
    %290 = arith.mulf %287, %285 : vector<8x64xf32>
    %291 = arith.addf %289, %290 : vector<8x64xf32>
    %292 = math.tanh %291 : vector<8x64xf32>
    %293 = arith.mulf %288, %292 : vector<8x64xf32>
    %294 = vector.extract_strided_slice %191 {offsets = [40, 0], sizes = [8, 256], strides = [1, 1]} : vector<64x256xf32> to vector<8x256xf32>
    %c0_78 = arith.constant 0 : index
    %c0_79 = arith.constant 0 : index
    %295 = vector.load %arg6[%c0_78, %c0_79] : memref<64x256xf32, #tpu.memory_space<vmem>>, vector<64x256xf32>
    %cst_80 = arith.constant dense<0.000000e+00> : vector<8x256xf32>
    %296 = tpu.matmul %293, %295, %cst_80 {dimension_numbers = #tpu.dot_dimension_numbers<[1], [0], [0], [1], [0, 0, 1, 1], [], []>} : vector<8x64xf32>, vector<64x256xf32>, vector<8x256xf32> -> vector<8x256xf32>
    %297 = arith.addf %294, %296 : vector<8x256xf32>
    %298 = vector.extract_strided_slice %297 {offsets = [0, 0], sizes = [8, 192], strides = [1, 1]} : vector<8x256xf32> to vector<8x192xf32>
    %299 = arith.negf %298 : vector<8x192xf32>
    %300 = math.exp %299 : vector<8x192xf32>
    %cst_81 = arith.constant 1.000000e+00 : f32
    %301 = vector.broadcast %cst_81 : f32 to vector<8x192xf32>
    %302 = arith.addf %301, %300 : vector<8x192xf32>
    %303 = arith.divf %301, %302 : vector<8x192xf32>
    %304 = vector.extract_strided_slice %297 {offsets = [0, 192], sizes = [8, 64], strides = [1, 1]} : vector<8x256xf32> to vector<8x64xf32>
    %305 = math.tanh %304 : vector<8x64xf32>
    %306 = vector.extract_strided_slice %303 {offsets = [0, 0], sizes = [8, 64], strides = [1, 1]} : vector<8x192xf32> to vector<8x64xf32>
    %307 = vector.extract_strided_slice %303 {offsets = [0, 64], sizes = [8, 64], strides = [1, 1]} : vector<8x192xf32> to vector<8x64xf32>
    %308 = vector.extract_strided_slice %303 {offsets = [0, 128], sizes = [8, 64], strides = [1, 1]} : vector<8x192xf32> to vector<8x64xf32>
    %309 = arith.mulf %306, %291 : vector<8x64xf32>
    %310 = arith.mulf %307, %305 : vector<8x64xf32>
    %311 = arith.addf %309, %310 : vector<8x64xf32>
    %312 = math.tanh %311 : vector<8x64xf32>
    %313 = arith.mulf %308, %312 : vector<8x64xf32>
    %314 = vector.extract_strided_slice %191 {offsets = [48, 0], sizes = [8, 256], strides = [1, 1]} : vector<64x256xf32> to vector<8x256xf32>
    %c0_82 = arith.constant 0 : index
    %c0_83 = arith.constant 0 : index
    %315 = vector.load %arg6[%c0_82, %c0_83] : memref<64x256xf32, #tpu.memory_space<vmem>>, vector<64x256xf32>
    %cst_84 = arith.constant dense<0.000000e+00> : vector<8x256xf32>
    %316 = tpu.matmul %313, %315, %cst_84 {dimension_numbers = #tpu.dot_dimension_numbers<[1], [0], [0], [1], [0, 0, 1, 1], [], []>} : vector<8x64xf32>, vector<64x256xf32>, vector<8x256xf32> -> vector<8x256xf32>
    %317 = arith.addf %314, %316 : vector<8x256xf32>
    %318 = vector.extract_strided_slice %317 {offsets = [0, 0], sizes = [8, 192], strides = [1, 1]} : vector<8x256xf32> to vector<8x192xf32>
    %319 = arith.negf %318 : vector<8x192xf32>
    %320 = math.exp %319 : vector<8x192xf32>
    %cst_85 = arith.constant 1.000000e+00 : f32
    %321 = vector.broadcast %cst_85 : f32 to vector<8x192xf32>
    %322 = arith.addf %321, %320 : vector<8x192xf32>
    %323 = arith.divf %321, %322 : vector<8x192xf32>
    %324 = vector.extract_strided_slice %317 {offsets = [0, 192], sizes = [8, 64], strides = [1, 1]} : vector<8x256xf32> to vector<8x64xf32>
    %325 = math.tanh %324 : vector<8x64xf32>
    %326 = vector.extract_strided_slice %323 {offsets = [0, 0], sizes = [8, 64], strides = [1, 1]} : vector<8x192xf32> to vector<8x64xf32>
    %327 = vector.extract_strided_slice %323 {offsets = [0, 64], sizes = [8, 64], strides = [1, 1]} : vector<8x192xf32> to vector<8x64xf32>
    %328 = vector.extract_strided_slice %323 {offsets = [0, 128], sizes = [8, 64], strides = [1, 1]} : vector<8x192xf32> to vector<8x64xf32>
    %329 = arith.mulf %326, %311 : vector<8x64xf32>
    %330 = arith.mulf %327, %325 : vector<8x64xf32>
    %331 = arith.addf %329, %330 : vector<8x64xf32>
    %332 = math.tanh %331 : vector<8x64xf32>
    %333 = arith.mulf %328, %332 : vector<8x64xf32>
    %334 = vector.extract_strided_slice %191 {offsets = [56, 0], sizes = [8, 256], strides = [1, 1]} : vector<64x256xf32> to vector<8x256xf32>
    %c0_86 = arith.constant 0 : index
    %c0_87 = arith.constant 0 : index
    %335 = vector.load %arg6[%c0_86, %c0_87] : memref<64x256xf32, #tpu.memory_space<vmem>>, vector<64x256xf32>
    %cst_88 = arith.constant dense<0.000000e+00> : vector<8x256xf32>
    %336 = tpu.matmul %333, %335, %cst_88 {dimension_numbers = #tpu.dot_dimension_numbers<[1], [0], [0], [1], [0, 0, 1, 1], [], []>} : vector<8x64xf32>, vector<64x256xf32>, vector<8x256xf32> -> vector<8x256xf32>
    %337 = arith.addf %334, %336 : vector<8x256xf32>
    %338 = vector.extract_strided_slice %337 {offsets = [0, 0], sizes = [8, 192], strides = [1, 1]} : vector<8x256xf32> to vector<8x192xf32>
    %339 = arith.negf %338 : vector<8x192xf32>
    %340 = math.exp %339 : vector<8x192xf32>
    %cst_89 = arith.constant 1.000000e+00 : f32
    %341 = vector.broadcast %cst_89 : f32 to vector<8x192xf32>
    %342 = arith.addf %341, %340 : vector<8x192xf32>
    %343 = arith.divf %341, %342 : vector<8x192xf32>
    %344 = vector.extract_strided_slice %337 {offsets = [0, 192], sizes = [8, 64], strides = [1, 1]} : vector<8x256xf32> to vector<8x64xf32>
    %345 = math.tanh %344 : vector<8x64xf32>
    %346 = vector.extract_strided_slice %343 {offsets = [0, 0], sizes = [8, 64], strides = [1, 1]} : vector<8x192xf32> to vector<8x64xf32>
    %347 = vector.extract_strided_slice %343 {offsets = [0, 64], sizes = [8, 64], strides = [1, 1]} : vector<8x192xf32> to vector<8x64xf32>
    %348 = vector.extract_strided_slice %343 {offsets = [0, 128], sizes = [8, 64], strides = [1, 1]} : vector<8x192xf32> to vector<8x64xf32>
    %349 = arith.mulf %346, %331 : vector<8x64xf32>
    %350 = arith.mulf %347, %345 : vector<8x64xf32>
    %351 = arith.addf %349, %350 : vector<8x64xf32>
    %352 = math.tanh %351 : vector<8x64xf32>
    %353 = arith.mulf %348, %352 : vector<8x64xf32>
    %354 = arith.truncf %353 : vector<8x64xf32> to vector<8x64xbf16>
    %c0_90 = arith.constant 0 : index
    %c0_91 = arith.constant 0 : index
    %355 = vector.load %arg8[%c0_90, %c0_91] : memref<64x64xbf16, #tpu.memory_space<vmem>>, vector<64x64xbf16>
    %cst_92 = arith.constant dense<0.000000e+00> : vector<8x64xf32>
    %356 = tpu.matmul %354, %355, %cst_92 {dimension_numbers = #tpu.dot_dimension_numbers<[1], [0], [0], [1], [0, 0, 1, 1], [], []>} : vector<8x64xbf16>, vector<64x64xbf16>, vector<8x64xf32> -> vector<8x64xf32>
    %c0_93 = arith.constant 0 : index
    %c0_94 = arith.constant 0 : index
    %357 = vector.load %arg9[%c0_93, %c0_94] : memref<1x64xf32, #tpu.memory_space<vmem>>, vector<1x64xf32>
    %358 = vector.broadcast %357 : vector<1x64xf32> to vector<8x64xf32>
    %359 = arith.addf %356, %358 : vector<8x64xf32>
    %cst_95 = arith.constant 0.000000e+00 : f32
    %360 = vector.broadcast %cst_95 : f32 to vector<8x64xf32>
    %361 = arith.cmpf ogt, %359, %360 : vector<8x64xf32>
    %cst_96 = arith.constant 0.00999999977 : f32
    %362 = vector.broadcast %cst_96 : f32 to vector<8x64xf32>
    %363 = arith.mulf %362, %359 : vector<8x64xf32>
    %364 = arith.select %361, %359, %363 : vector<8x64xi1>, vector<8x64xf32>
    %365 = arith.truncf %364 : vector<8x64xf32> to vector<8x64xbf16>
    %c0_97 = arith.constant 0 : index
    %c0_98 = arith.constant 0 : index
    %366 = vector.load %arg10[%c0_97, %c0_98] : memref<64x64xbf16, #tpu.memory_space<vmem>>, vector<64x64xbf16>
    %cst_99 = arith.constant dense<0.000000e+00> : vector<8x64xf32>
    %367 = tpu.matmul %365, %366, %cst_99 {dimension_numbers = #tpu.dot_dimension_numbers<[1], [0], [0], [1], [0, 0, 1, 1], [], []>} : vector<8x64xbf16>, vector<64x64xbf16>, vector<8x64xf32> -> vector<8x64xf32>
    %c0_100 = arith.constant 0 : index
    %c0_101 = arith.constant 0 : index
    %368 = vector.load %arg11[%c0_100, %c0_101] : memref<1x64xf32, #tpu.memory_space<vmem>>, vector<1x64xf32>
    %369 = vector.broadcast %368 : vector<1x64xf32> to vector<8x64xf32>
    %370 = arith.addf %367, %369 : vector<8x64xf32>
    %cst_102 = arith.constant 0.000000e+00 : f32
    %371 = vector.broadcast %cst_102 : f32 to vector<8x64xf32>
    %372 = arith.cmpf ogt, %370, %371 : vector<8x64xf32>
    %cst_103 = arith.constant 0.00999999977 : f32
    %373 = vector.broadcast %cst_103 : f32 to vector<8x64xf32>
    %374 = arith.mulf %373, %370 : vector<8x64xf32>
    %375 = arith.select %372, %370, %374 : vector<8x64xi1>, vector<8x64xf32>
    %376 = arith.addf %375, %353 : vector<8x64xf32>
    %c0_104 = arith.constant 0 : index
    %c0_105 = arith.constant 0 : index
    %377 = vector.load %arg12[%c0_104, %c0_105] : memref<1x64xf32, #tpu.memory_space<vmem>>, vector<1x64xf32>
    %378 = vector.broadcast %377 : vector<1x64xf32> to vector<8x64xf32>
    %379 = arith.mulf %376, %378 : vector<8x64xf32>
    %cst_106 = arith.constant dense<0.000000e+00> : vector<8xf32>
    %380 = vector.multi_reduction <add>, %379, %cst_106 [1] : vector<8x64xf32> to vector<8xf32>
    %381 = vector.shape_cast %380 : vector<8xf32> to vector<8x1xf32>
    %c0_107 = arith.constant 0 : index
    %c0_108 = arith.constant 0 : index
    %382 = vector.load %arg13[%c0_107, %c0_108] : memref<1x1xf32, #tpu.memory_space<vmem>>, vector<1x1xf32>
    %383 = vector.broadcast %382 : vector<1x1xf32> to vector<8x1xf32>
    %384 = arith.addf %381, %383 : vector<8x1xf32>
    %cst_109 = arith.constant 0.000000e+00 : f32
    %385 = vector.broadcast %cst_109 : f32 to vector<8x1xf32>
    %386 = arith.cmpf ogt, %384, %385 : vector<8x1xf32>
    %cst_110 = arith.constant 0.00999999977 : f32
    %387 = vector.broadcast %cst_110 : f32 to vector<8x1xf32>
    %388 = arith.mulf %387, %384 : vector<8x1xf32>
    %389 = arith.select %386, %384, %388 : vector<8x1xi1>, vector<8x1xf32>
    %390 = tpu.transpose %389, [1, 0] : vector<8x1xf32> -> vector<1x8xf32>
    %391 = vector.shape_cast %390 : vector<1x8xf32> to vector<1x1x8xf32>
    %c0_111 = arith.constant 0 : index
    %c0_112 = arith.constant 0 : index
    %c0_113 = arith.constant 0 : index
    %392 = vector.load %arg14[%c0_111, %c0_112, %c0_113] : memref<1x1x8xf32, #tpu.memory_space<vmem>>, vector<1x1x8xf32>
    tpu.vector_store %arg14[%c0_111, %c0_112, %c0_113], %391 {strides = array<i32>} : memref<1x1x8xf32, #tpu.memory_space<vmem>>, vector<1x1x8xf32>,
    return
  }
  func.func @transform_0(%arg0: i32) -> (i32, i32, i32) {
    %c0_i32 = arith.constant 0 : i32
    %c0_i32_0 = arith.constant 0 : i32
    %c0_i32_1 = arith.constant 0 : i32
    return %c0_i32, %arg0, %c0_i32_0 : i32, i32, i32
  }
  func.func @transform_1(%arg0: i32) -> (i32, i32) {
    %c0_i32 = arith.constant 0 : i32
    %c0_i32_0 = arith.constant 0 : i32
    %c0_i32_1 = arith.constant 0 : i32
    return %c0_i32, %c0_i32_0 : i32, i32
  }
  func.func @transform_2(%arg0: i32) -> (i32, i32) {
    %c0_i32 = arith.constant 0 : i32
    %c0_i32_0 = arith.constant 0 : i32
    %c0_i32_1 = arith.constant 0 : i32
    return %c0_i32, %c0_i32_0 : i32, i32
  }
  func.func @transform_3(%arg0: i32) -> (i32, i32) {
    %c0_i32 = arith.constant 0 : i32
    %c0_i32_0 = arith.constant 0 : i32
    %c0_i32_1 = arith.constant 0 : i32
    return %c0_i32, %c0_i32_0 : i32, i32
  }
  func.func @transform_4(%arg0: i32) -> (i32, i32) {
    %c0_i32 = arith.constant 0 : i32
    %c0_i32_0 = arith.constant 0 : i32
    %c0_i32_1 = arith.constant 0 : i32
    return %c0_i32, %c0_i32_0 : i32, i32
  }
  func.func @transform_5(%arg0: i32) -> (i32, i32) {
    %c0_i32 = arith.constant 0 : i32
    %c0_i32_0 = arith.constant 0 : i32
    %c0_i32_1 = arith.constant 0 : i32
    return %c0_i32, %c0_i32_0 : i32, i32
  }
  func.func @transform_6(%arg0: i32) -> (i32, i32) {
    %c0_i32 = arith.constant 0 : i32
    %c0_i32_0 = arith.constant 0 : i32
    %c0_i32_1 = arith.constant 0 : i32
    return %c0_i32, %c0_i32_0 : i32, i32
  }
  func.func @transform_7(%arg0: i32) -> (i32, i32) {
    %c0_i32 = arith.constant 0 : i32
    %c0_i32_0 = arith.constant 0 : i32
    %c0_i32_1 = arith.constant 0 : i32
    return %c0_i32, %c0_i32_0 : i32, i32
  }
  func.func @transform_8(%arg0: i32) -> (i32, i32) {
    %c0_i32 = arith.constant 0 : i32
    %c0_i32_0 = arith.constant 0 : i32
    %c0_i32_1 = arith.constant 0 : i32
    return %c0_i32, %c0_i32_0 : i32, i32
  }
  func.func @transform_9(%arg0: i32) -> (i32, i32) {
    %c0_i32 = arith.constant 0 : i32
    %c0_i32_0 = arith.constant 0 : i32
    %c0_i32_1 = arith.constant 0 : i32
    return %c0_i32, %c0_i32_0 : i32, i32
  }
  func.func @transform_10(%arg0: i32) -> (i32, i32) {
    %c0_i32 = arith.constant 0 : i32
    %c0_i32_0 = arith.constant 0 : i32
    %c0_i32_1 = arith.constant 0 : i32
    return %c0_i32, %c0_i32_0 : i32, i32
  }
  func.func @transform_11(%arg0: i32) -> (i32, i32) {
    %c0_i32 = arith.constant 0 : i32
    %c0_i32_0 = arith.constant 0 : i32
    %c0_i32_1 = arith.constant 0 : i32
    return %c0_i32, %c0_i32_0 : i32, i32
  }
  func.func @transform_12(%arg0: i32) -> (i32, i32) {
    %c0_i32 = arith.constant 0 : i32
    %c0_i32_0 = arith.constant 0 : i32
    %c0_i32_1 = arith.constant 0 : i32
    return %c0_i32, %c0_i32_0 : i32, i32
  }
  func.func @transform_13(%arg0: i32) -> (i32, i32, i32) {
    %c0_i32 = arith.constant 0 : i32
    %c0_i32_0 = arith.constant 0 : i32
    %c0_i32_1 = arith.constant 0 : i32
    return %arg0, %c0_i32, %c0_i32_0 : i32, i32, i32
  }
}

</mosaic_0001>

<bundles_post_ra>
// kernel: _forward_jit.1
= control target key start
LH: loop header
LB: loop body
LE: loop exit
PB: predicated region body
PF: predicated region fallthrough
CT: control target
= control target key end

     0   :  { %s3708_s0 = inlined_call_operand.vmem [shape: f32[8,8,16], index: 0, kind: input, shape index: {}]   ;;  %s3709_s1 = inlined_call_operand.vmem [shape: bf16[16,256], index: 1, kind: input, shape index: {}]   ;;  %s3710_s2 = inlined_call_operand.vmem [shape: f32[64,256], index: 2, kind: input, shape index: {}]   ;;  %s3711_s3 = inlined_call_operand.hbm [shape: f32[1,256], index: 3, kind: input, shape index: {}]   ;;  %s3712_s4 = inlined_call_operand.hbm [shape: bf16[64,256], index: 4, kind: input, shape index: {}]   ;;  %s3713_s5 = inlined_call_operand.vmem [shape: f32[64,256], index: 5, kind: input, shape index: {}]   ;;  %s3714_s6 = inlined_call_operand.hbm [shape: f32[1,256], index: 6, kind: input, shape index: {}]   ;;  %s3715_s7 = inlined_call_operand.hbm [shape: bf16[64,64], index: 7, kind: input, shape index: {}]   ;;  %s3716_s8 = inlined_call_operand.vmem [shape: f32[1,64], index: 8, kind: input, shape index: {}]   ;;  %s3717_s9 = inlined_call_operand.hbm [shape: bf16[64,64], index: 9, kind: input, shape index: {}]   ;;  %s3718_s10 = inlined_call_operand.hbm [shape: f32[1,64], index: 10, kind: input, shape index: {}]   ;;  %s3719_s11 = inlined_call_operand.hbm [shape: f32[1,64], index: 11, kind: input, shape index: {}]   ;;  %s3720_s12 = inlined_call_operand.<no memory space> [shape: f32[1,1], index: 12, kind: input, shape index: {}]   ;;  %s3721_s13 = inlined_call_operand.hbm [shape: f32[1,1,8], index: 13, kind: output, shape index: {}]  }
   0x1   :  { %v18_v0 = vstv %s3720_s12 }
   0x2   :  { %19 = vst [vmem:[#allocation3] sm:$0x1] %v18_v0 }
   0x3   :  { %20 = vsyncpa [#allocation5], 0 }
   0x4   :  { %21 = vsyncpa [#allocation8], 0 }
   0x5   :  { %22 = vsyncpa [#allocation11], 0 }
   0x6   :  { %23 = vsyncpa [#allocation14], 0 }
   0x7   :  { %24 = vsyncpa [#allocation6], 0  ;;  %s2924_s27 = smov [#allocation7]  }
   0x8   :  { %s46_s28 = sshll.u32 %s2924_s27, 4  ;;  %s47_s28 = int_to_ptr.vmem [resolvable:$true] %s46_s28 }
   0x9   :  { %s2762_s29 = scalar_lea.vmem %s47_s28, 1024  ;;  %p2767_p1 = scmp.lt.s32.totalorder %s47_s28, %s47_s28 }
   0xa   :  { %p2763_p0 = scmp.ne.s32.totalorder %s47_s28, %s2762_s29  ;;  %p2768_p2 = scmp.lt.s32.totalorder %s2762_s29, %s2762_s29 }
   0xc   :  { %p2769_p3 = por %p2768_p2, %p2767_p1 }
   0xe   :  { %p2770_p4 = pnand %p2769_p3, %p2763_p0 }
  0x10   :  { %2773 = shalt.err (!%p2770_p4)
}
  0x11   :  { %s2925_s30 = smov 128   ;;  %s2926_s14 = smov 8  }
  0x12   :  { %52 = dma.hbm_to_vmem [thread:$0]  %s3712_s4, 1024, %s47_s28, [#allocation8], %s2925_s30, %s2925_s30, %s2926_s14  }
  0x13   :  { %s2927_s16 = smov [#allocation10]  }
  0x14   :  { %s70_s17 = sshll.u32 %s2927_s16, 4  ;;  %s71_s17 = int_to_ptr.vmem [resolvable:$true] %s70_s17 }
  0x15   :  { %s2782_s18 = scalar_lea.vmem %s71_s17, 512  ;;  %p2787_p6 = scmp.lt.s32.totalorder %s71_s17, %s71_s17 }
  0x16   :  { %p2783_p5 = scmp.ne.s32.totalorder %s71_s17, %s2782_s18  ;;  %p2788_p7 = scmp.lt.s32.totalorder %s2782_s18, %s2782_s18 }
  0x18   :  { %p2789_p8 = por %p2788_p7, %p2787_p6 }
  0x1a   :  { %p2790_p9 = pnand %p2789_p8, %p2783_p5 }
  0x1c   :  { %2793 = shalt.err (!%p2790_p9)
}
  0x1d   :  { %s2928_s19 = smov 64   ;;  %s2929_s20 = smov 4  }
  0x1e   :  { %76 = dma.hbm_to_vmem [thread:$0]  %s3715_s7, 512, %s71_s17, [#allocation11], %s2928_s19, %s2928_s19, %s2929_s20  }
  0x1f   :  { %s2930_s4 = smov [#allocation13]   ;;  %s2931_s24 = smov [#allocation4]  }
  0x20   :  { %s97_s23 = sshll.u32 %s2930_s4, 4  ;;  %s37_s25 = sshll.u32 %s2931_s24, 4  ;;  %s98_s23 = int_to_ptr.vmem [resolvable:$true] %s97_s23  ;;  %s38_s25 = int_to_ptr.vmem [resolvable:$true] %s37_s25 }
  0x21   :  { %s2802_s26 = scalar_lea.vmem %s98_s23, 16  ;;  %s2806_s27 = scalar_lea.vmem %s98_s23, 32 }
  0x22   :  { %p2803_p10 = scmp.ne.s32.totalorder %s98_s23, %s2802_s26  ;;  %p2807_p11 = scmp.lt.s32.totalorder %s98_s23, %s98_s23 }
  0x23   :  { %p2808_p12 = scmp.lt.s32.totalorder %s2806_s27, %s2802_s26 }
  0x25   :  { %p2809_p13 = por %p2808_p12, %p2807_p11 }
  0x27   :  { %p2810_p0 = pnand %p2809_p13, %p2803_p10 }
  0x29   :  { %2813 = shalt.err (!%p2810_p0)
}
  0x2a   :  { %100 = dma.hbm_to_vmem [thread:$0]  %s3718_s10, 16, %s98_s23, [#allocation14]  }
  0x2b   :  { %s2822_s30 = scalar_lea.vmem %s38_s25, 32  ;;  %p2827_p2 = scmp.lt.s32.totalorder %s38_s25, %s38_s25 }
  0x2c   :  { %p2823_p1 = scmp.ne.s32.totalorder %s38_s25, %s2822_s30  ;;  %p2828_p3 = scmp.lt.s32.totalorder %s2822_s30, %s2822_s30 }
  0x2e   :  { %p2829_p4 = por %p2828_p3, %p2827_p2 }
  0x30   :  { %p2830_p5 = pnand %p2829_p4, %p2823_p1 }
  0x32   :  { %2833 = shalt.err (!%p2830_p5)
}
  0x33   :  { %40 = dma.hbm_to_vmem [thread:$0]  %s3711_s3, 32, %s38_s25, [#allocation5]  }
  0x34   :  { %s2932_s15 = smov [#allocation9]   ;;  %s2933_s16 = smov [#allocation12]  }
  0x35   :  { %s61_s12 = sshll.u32 %s2932_s15, 4  ;;  %s84_s17 = sshll.u32 %s2933_s16, 4  ;;  %s62_s12 = int_to_ptr.vmem [resolvable:$true] %s61_s12  ;;  %s85_s17 = int_to_ptr.vmem [resolvable:$true] %s84_s17 }
  0x36   :  { %s2842_s18 = scalar_lea.vmem %s62_s12, 32  ;;  %p2847_p7 = scmp.lt.s32.totalorder %s62_s12, %s62_s12 }
  0x37   :  { %p2843_p6 = scmp.ne.s32.totalorder %s62_s12, %s2842_s18  ;;  %p2848_p8 = scmp.lt.s32.totalorder %s2842_s18, %s2842_s18 }
  0x39   :  { %p2849_p9 = por %p2848_p8, %p2847_p7 }
  0x3b   :  { %p2850_p10 = pnand %p2849_p9, %p2843_p6 }
  0x3d   :  { %2853 = shalt.err (!%p2850_p10)
}
  0x3e   :  { %64 = dma.hbm_to_vmem [thread:$0]  %s3714_s6, 32, %s62_s12, [#allocation8]  }
  0x3f   :  { %s2862_s22 = scalar_lea.vmem %s85_s17, 512  ;;  %p2867_p12 = scmp.lt.s32.totalorder %s85_s17, %s85_s17 }
  0x40   :  { %p2863_p11 = scmp.ne.s32.totalorder %s85_s17, %s2862_s22  ;;  %p2868_p13 = scmp.lt.s32.totalorder %s2862_s22, %s2862_s22 }
  0x42   :  { %p2869_p0 = por %p2868_p13, %p2867_p12 }
  0x44   :  { %p2870_p1 = pnand %p2869_p0, %p2863_p11 }
  0x46   :  { %2873 = shalt.err (!%p2870_p1)
}
  0x47   :  { %90 = dma.hbm_to_vmem [thread:$0]  %s3717_s9, 512, %s85_s17, [#allocation11], %s2928_s19, %s2928_s19, %s2929_s20  }
  0x48   :  { %s2934_s23 = smov [#allocation15]  }
  0x49   :  { %s107_s24 = sshll.u32 %s2934_s23, 4  ;;  %s108_s24 = int_to_ptr.vmem [resolvable:$true] %s107_s24 }
  0x4a   :  { %s2882_s25 = scalar_lea.vmem %s108_s24, 16  ;;  %s2886_s6 = scalar_lea.vmem %s108_s24, 32 }
  0x4b   :  { %p2883_p2 = scmp.ne.s32.totalorder %s108_s24, %s2882_s25  ;;  %p2887_p3 = scmp.lt.s32.totalorder %s108_s24, %s108_s24 }
  0x4c   :  { %p2888_p4 = scmp.lt.s32.totalorder %s2886_s6, %s2882_s25 }
  0x4e   :  { %p2889_p5 = por %p2888_p4, %p2887_p3 }
  0x50   :  { %p2890_p6 = pnand %p2889_p5, %p2883_p2 }
  0x52   :  { %2893 = shalt.err (!%p2890_p6)
}
  0x53   :  { %110 = dma.hbm_to_vmem [thread:$0]  %s3719_s11, 16, %s108_s24, [#allocation14]  }
  0x54   :  { %2914 = dma.done.wait [#allocation5], 32  }
  0x55   :  { %2915 = vsyncadd [#allocation5], 4294967264 }
  0x56   :  { %2916 = dma.done.wait [#allocation8], 1056  }
  0x57   :  { %2917 = vsyncadd [#allocation8], 4294966240 }
  0x58   :  { %2918 = dma.done.wait [#allocation11], 1024  }
  0x59   :  { %2919 = vsyncadd [#allocation11], 4294966272 }
  0x5a   :  { %2920 = dma.done.wait [#allocation14], 32  }
  0x5b   :  { %2921 = vsyncadd [#allocation14], 4294967264  ;;  %v2935_v1 = vmov 0   ;;  %v2936_v2 = vmov 0.0   ;;  %v3044_v3 = vld [vmem:[%s3710_s2 + $0x78] sm:$0xff]  ;;  %v3049_v4 = vld [vmem:[%s3710_s2 + $0x70] sm:$0xff]  ;;  %v151_v24 = vlaneseq }
  0x5c   :  { %216 = vmatprep.mubr.bf16.mxu0 %v2935_v1  ;;  %341 = vmatprep.mubr.f32.mxu1 %v2936_v2  ;;  %v3054_v5 = vld [vmem:[%s3710_s2 + $0x68] sm:$0xff]  ;;  %v3060_v6 = vld [vmem:[%s3710_s2 + $0x60] sm:$0xff]  ;;  %v3069_v8 = vld [vmem:[%s3710_s2 + $0x58] sm:$0xff]  ;;  %vm171_vm0 = vcmask 130048   ;;  %vm273_vm1 = vcmask 523264   ;;  %vm373_vm2 = vcmask 519168  }
  0x5d   :  { %293 = vmatprep.subr.mxu1 %v3044_v3  ;;  %v2535_v7 = vld [vmem:[%s3709_s1 + $0x4] ss:$8 sps:$4 sm:$0xff]   ;;  %v2537_v9 = vld [vmem:[%s3709_s1] ss:$8 sps:$4 sm:$0xff]   ;;  %v3078_v10 = vld [vmem:[%s3710_s2 + $0x50] sm:$0xff]  ;;  %v3187_v25 = vshrl.u32 %v151_v24, 7 }
  0x5e   :  { %294 = vmatpush1.msra.mxu1 %v3049_v4  ;;  %198 = vmatprep.subr.bf16.mxu0 %v2535_v7  ;;  %v3084_v11 = vld [vmem:[%s3710_s2 + $0x48] sm:$0xff]  ;;  %v135_v12 = vld [vmem:[%s3708_s0] sm:$0xff]  ;;  %v3102_v16 = vld [vmem:[%s3710_s2 + $0x38] sm:$0xff]  ;;  %vm2937_vm3 = vmmov 0   ;;  %vm2384_vm7 = vcmask 57344  }
  0x5f   :  { %295 = vmatprep.subr.mxu1 %v3054_v5  ;;  %v136_v13 = vld [vmem:[%s3708_s0 + $0x8] sm:$0xff]  ;;  %199 = vmatpush1.bf16.msra.mxu0 %v2537_v9  ;;  %v3096_v14 = vld [vmem:[%s3710_s2 + $0x40] sm:$0xff]  ;;  %v3107_v17 = vld [vmem:[%s3710_s2 + $0x30] sm:$0xff]  ;;  %v153_v26 = vsub.s32 0, %v3187_v25  ;;  %v157_v34 = vsub.s32 1, %v3187_v25 }
  0x60   :  { %296 = vmatpush1.msra.mxu1 %v3060_v6  ;;  %v143_v15 = vpack.c.bf16 %v136_v13, %v135_v12  ;;  %526 = vmatprep.subr.mxu0 %v3044_v3  ;;  %v3114_v18 = vld [vmem:[%s3710_s2 + $0x28] sm:$0xff]  ;;  %v3119_v19 = vld [vmem:[%s3710_s2 + $0x20] sm:$0xff]  ;;  %v3126_v20 = vld [vmem:[%s3710_s2 + $0x18] sm:$0xff] }
  0x61   :  { %297 = vmatprep.subr.mxu1 %v3069_v8  ;;  %v3132_v21 = vld [vmem:[%s3710_s2 + $0x10] sm:$0xff]  ;;  %v3139_v22 = vld [vmem:[%s3710_s2 + $0x8] sm:$0xff]  ;;  %v3146_v23 = vld [vmem:[%s3710_s2] sm:$0xff] }
  0x62   :  { %298 = vmatpush1.msra.mxu1 %v3078_v10  ;;  %2406 = vmatmul.mubr.msk.bf16.vlgmr.msra.gmra.mxu0 %vm171_vm0, %v143_v15  ;;  %v149_v27 = vld [vmem:[#allocation4] sm:$0x3]  ;;  %v137_v55 = vld [vmem:[%s3708_s0 + $0x10] sm:$0xff]  ;;  %v138_v56 = vld [vmem:[%s3708_s0 + $0x18] sm:$0xff] }
  0x63   :  { %299 = vmatprep.subr.mxu1 %v3084_v11  ;;  %527 = vmatpush1.msra.mxu0 %v3049_v4  ;;  %v3192_v28 = vrot.slane %v149_v27, %v153_v26  ;;  %v3198_v35 = vrot.slane %v149_v27, %v157_v34  ;;  %v144_v57 = vpack.c.bf16 %v138_v56, %v137_v55  ;;  %v139_v58 = vld [vmem:[%s3708_s0 + $0x20] sm:$0xff]  ;;  %v140_v59 = vld [vmem:[%s3708_s0 + $0x28] sm:$0xff] }
  0x64   :  { %300 = vmatpush1.msra.mxu1 %v3096_v14  ;;  %226 = vmatprep.mubr.bf16.mxu0 %v2935_v1  ;;  %v145_v60 = vpack.c.bf16 %v140_v59, %v139_v58 }
  0x65   :  { %301 = vmatprep.subr.mxu1 %v3102_v16  ;;  %528 = vmatprep.subr.mxu0 %v3054_v5 }
  0x66   :  { %302 = vmatpush1.msra.mxu1 %v3107_v17  ;;  %529 = vmatpush1.msra.mxu0 %v3060_v6 }
  0x67   :  { %303 = vmatprep.subr.mxu1 %v3114_v18  ;;  %530 = vmatprep.subr.mxu0 %v3069_v8 }
  0x68   :  { %304 = vmatpush1.msra.mxu1 %v3119_v19  ;;  %531 = vmatpush1.msra.mxu0 %v3078_v10 }
  0x69   :  { %305 = vmatprep.subr.mxu1 %v3126_v20  ;;  %532 = vmatprep.subr.mxu0 %v3084_v11 }
  0x6a   :  { %306 = vmatpush1.msra.mxu1 %v3132_v21  ;;  %533 = vmatpush1.msra.mxu0 %v3096_v14 }
  0x6b   :  { %307 = vmatprep.subr.mxu1 %v3139_v22  ;;  %534 = vmatprep.subr.mxu0 %v3102_v16 }
  0x6c   :  { %308 = vmatpush1.msra.mxu1 %v3146_v23  ;;  %535 = vmatpush1.msra.mxu0 %v3107_v17 }
  0x6d   :  { %342 = vmatmul.mubr.f32.vlgmr.msra.gmra.mxu1 %v2936_v2  ;;  %410 = vmatprep.subr.mxu1 %v3044_v3 }
  0x6e   :  { %411 = vmatpush1.msra.mxu1 %v3049_v4  ;;  %458 = vmatprep.mubr.f32.mxu1 %v2936_v2 }
  0x6f   :  { %412 = vmatprep.subr.mxu1 %v3054_v5  ;;  %536 = vmatprep.subr.mxu0 %v3114_v18 }
  0x70   :  { %413 = vmatpush1.msra.mxu1 %v3060_v6  ;;  %537 = vmatpush1.msra.mxu0 %v3119_v19 }
  0x71   :  { %414 = vmatprep.subr.mxu1 %v3069_v8  ;;  %538 = vmatprep.subr.mxu0 %v3126_v20 }
  0x72   :  { %415 = vmatpush1.msra.mxu1 %v3078_v10  ;;  %539 = vmatpush1.msra.mxu0 %v3132_v21 }
  0x73   :  { %416 = vmatprep.subr.mxu1 %v3084_v11  ;;  %540 = vmatprep.subr.mxu0 %v3139_v22 }
  0x74   :  { %417 = vmatpush1.msra.mxu1 %v3096_v14  ;;  %541 = vmatpush1.msra.mxu0 %v3146_v23 }
  0x75   :  { %418 = vmatprep.subr.mxu1 %v3102_v16  ;;  %758 = vmatprep.subr.mxu0 %v3044_v3 }
  0x76   :  { %419 = vmatpush1.msra.mxu1 %v3107_v17  ;;  %2407 = vmatmul.mubr.msk.bf16.gmra.mxu0 %vm171_vm0, %v144_v57 }
  0x77   :  { %420 = vmatprep.subr.mxu1 %v3114_v18  ;;  %236 = vmatprep.mubr.bf16.mxu0 %v2935_v1 }
  0x78   :  { %421 = vmatpush1.msra.mxu1 %v3119_v19 }
  0x79   :  { %422 = vmatprep.subr.mxu1 %v3126_v20 }
  0x7a   :  { %423 = vmatpush1.msra.mxu1 %v3132_v21 }
  0x7b   :  { %424 = vmatprep.subr.mxu1 %v3139_v22 }
  0x7c   :  { %425 = vmatpush1.msra.mxu1 %v3146_v23 }
  0x7d   :  { %642 = vmatprep.subr.mxu1 %v3044_v3 }
  0x7e   :  { %2408 = vmatmul.mubr.msk.bf16.gmra.mxu0 %vm171_vm0, %v145_v60 }
  0x7f   :  { %246 = vmatprep.mubr.bf16.mxu0 %v2935_v1 }
 0x122   :  { %v218_v29 = vpop.f32.mrf.mxu0 }
 0x123   :  { %v219_v30 = vadd.f32 %v218_v29, %v3192_v28  ;;  %v141_v29 = vld [vmem:[%s3708_s0 + $0x30] sm:$0xff] }
 0x124   :  { %v220_v36 = vpop.f32.mrf.mxu0 }
 0x125   :  { %v221_v38 = vadd.f32 %v220_v36, %v3198_v35 }
 0x126   :  { %v222_v61 = vpop.f32.mrf.mxu0 }
 0x127   :  { %v223_v62 = vadd.f32 %v222_v61, %v3192_v28 }
 0x128   :  { %v224_v9 = vpop.f32.mrf.mxu0 }
 0x129   :  { %v225_v13 = vadd.f32 %v224_v9, %v3198_v35 }
 0x12d   :  { %v343_v31 = vpop.f32.mrf.mxu1 }
 0x12e   :  { %v348_v32 = vadd.f32 %v343_v31, %v219_v30  ;;  %v142_v30 = vld [vmem:[%s3708_s0 + $0x38] sm:$0xff] }
 0x12f   :  { %v345_v37 = vpop.f32.mrf.mxu1  ;;  %v146_v31 = vpack.c.bf16 %v142_v30, %v141_v29 }
 0x130   :  { %v2410_v33 = vmul.f32 -1.442695, %v348_v32  ;;  %v349_v39 = vadd.f32 %v345_v37, %v221_v38 }
 0x131   :  { %2409 = vmatmul.mubr.msk.bf16.gmra.mxu0 %vm171_vm0, %v146_v31 }
 0x132   :  { %2562 = vpow2.f32 %v2410_v33  ;;  %v2411_v45 = vmul.f32 -1.442695, %v349_v39  ;;  %574 = vmatprep.mubr.f32.mxu0 %v2936_v2 }
 0x133   :  { %2564 = vtanh.f32 %v349_v39 }
 0x13f   :  { %v2563_v40 = vpop.eup %2562 }
 0x140   :  { %v356_v41 = vadd.f32 1.0, %v2563_v40  ;;  %v2565_v42 = vpop.eup %2564 }
 0x142   :  { %2566 = vrcp.f32 %v356_v41 }
 0x143   :  { %2568 = vpow2.f32 %v2411_v45 }
 0x14f   :  { %v2567_v43 = vpop.eup %2566 }
 0x150   :  { %v364_v44 = vmul.f32 %v2567_v43, %v2565_v42  ;;  %v2569_v46 = vpop.eup %2568  ;;  %v363_v48 = vmul.f32 0.0, %v2567_v43 }
 0x151   :  { %v357_v47 = vadd.f32 1.0, %v2569_v46 }
 0x152   :  { %366 = vrot.lane.b32.xlu0 %v364_v44, %s2928_s19 }
 0x153   :  { %2570 = vrcp.f32 %v357_v47  ;;  %v228_v47 = vpop.f32.mrf.mxu0 }
 0x160   :  { %v2571_v51 = vpop.eup %2570 }
 0x1c4   :  { %v367_v49 = vpop.permute.xlu0 %366 }
 0x1c5   :  { %v3202_v50 = vadd.f32 %v367_v49, %v363_v48  ;;  %v230_v48 = vpop.f32.mrf.mxu0 }
 0x1c7   :  { %2572 = vtanh.f32 %v3202_v50  ;;  %v232_v49 = vpop.f32.mrf.mxu0 }
 0x1d4   :  { %v2573_v52 = vpop.eup %2572 }
 0x1d5   :  { %v371_v53 = vmul.f32 %v2573_v52, %v2571_v51 }
 0x1d7   :  { %v372_v54 = vpack.c.bf16 %v371_v53, %v371_v53  ;;  %2412 = vmatmul.mubr.msk.f32.vlgmr.msra.gmra.mxu1 %vm273_vm1, %v371_v53 }
 0x1d8   :  { %643 = vmatpush1.msra.mxu1 %v3049_v4  ;;  %690 = vmatprep.mubr.f32.mxu1 %v2936_v2 }
 0x1d9   :  { %374 = vst.msk [vmem:[#allocation2] sm:$0xf] %vm373_vm2, %v372_v54  ;;  %644 = vmatprep.subr.mxu1 %v3054_v5 }
 0x1da   :  { %645 = vmatpush1.msra.mxu1 %v3060_v6 }
 0x1db   :  { %646 = vmatprep.subr.mxu1 %v3069_v8 }
 0x1dc   :  { %647 = vmatpush1.msra.mxu1 %v3078_v10 }
 0x1dd   :  { %648 = vmatprep.subr.mxu1 %v3084_v11 }
 0x1de   :  { %649 = vmatpush1.msra.mxu1 %v3096_v14 }
 0x1df   :  { %650 = vmatprep.subr.mxu1 %v3102_v16 }
 0x1e0   :  { %651 = vmatpush1.msra.mxu1 %v3107_v17 }
 0x1e1   :  { %652 = vmatprep.subr.mxu1 %v3114_v18 }
 0x1e2   :  { %653 = vmatpush1.msra.mxu1 %v3119_v19 }
 0x1e3   :  { %654 = vmatprep.subr.mxu1 %v3126_v20 }
 0x1e4   :  { %655 = vmatpush1.msra.mxu1 %v3132_v21 }
 0x1e5   :  { %656 = vmatprep.subr.mxu1 %v3139_v22 }
 0x1e6   :  { %657 = vmatpush1.msra.mxu1 %v3146_v23 }
 0x1e7   :  { %874 = vmatprep.subr.mxu1 %v3044_v3 }
 0x297   :  { %v460_v63 = vpop.f32.mrf.mxu1 }
 0x298   :  { %v465_v0 = vadd.f32 %v460_v63, %v223_v62  ;;  %v231_v63 = vadd.f32 %v230_v48, %v3198_v35 }
 0x299   :  { %v462_v12 = vpop.f32.mrf.mxu1 }
 0x29a   :  { %v2413_v7 = vmul.f32 -1.442695, %v465_v0  ;;  %v466_v15 = vadd.f32 %v462_v12, %v225_v13 }
 0x29c   :  { %2574 = vpow2.f32 %v2413_v7  ;;  %v2414_v37 = vmul.f32 -1.442695, %v466_v15 }
 0x29d   :  { %2576 = vtanh.f32 %v466_v15 }
 0x2a9   :  { %v2575_v24 = vpop.eup %2574 }
 0x2aa   :  { %v473_v27 = vadd.f32 1.0, %v2575_v24  ;;  %v2577_v32 = vpop.eup %2576 }
 0x2ac   :  { %2578 = vrcp.f32 %v473_v27 }
 0x2ad   :  { %2580 = vpow2.f32 %v2414_v37 }
 0x2b9   :  { %v2579_v33 = vpop.eup %2578 }
 0x2ba   :  { %v481_v36 = vmul.f32 %v2579_v33, %v2577_v32  ;;  %v2581_v38 = vpop.eup %2580  ;;  %v480_v40 = vmul.f32 %v2579_v33, %v3202_v50  ;;  %v234_v50 = vpop.f32.mrf.mxu0 }
 0x2bb   :  { %v474_v39 = vadd.f32 1.0, %v2581_v38 }
 0x2bc   :  { %483 = vrot.lane.b32.xlu0 %v481_v36, %s2928_s19  ;;  %v3271_v51 = vpop.f32.mrf.mxu0 }
 0x2bd   :  { %2582 = vrcp.f32 %v474_v39  ;;  %v233_v39 = vadd.f32 %v232_v49, %v3192_v28 }
 0x2be   :  { %v3273_v52 = vpop.f32.mrf.mxu0 }
 0x2c0   :  { %v3275_v53 = vpop.f32.mrf.mxu0 }
 0x2c2   :  { %v3277_v54 = vpop.f32.mrf.mxu0 }
 0x2c4   :  { %v3279_v55 = vpop.f32.mrf.mxu0 }
 0x2c6   :  { %v3281_v56 = vpop.f32.mrf.mxu0 }
 0x2c8   :  { %v3283_v57 = vpop.f32.mrf.mxu0 }
 0x2ca   :  { %v2583_v43 = vpop.eup %2582  ;;  %v3285_v58 = vpop.f32.mrf.mxu0 }
 0x32e   :  { %v484_v41 = vpop.permute.xlu0 %483 }
 0x32f   :  { %v486_v42 = vadd.f32 %v484_v41, %v480_v40 }
 0x331   :  { %2584 = vtanh.f32 %v486_v42 }
 0x33e   :  { %v2585_v44 = vpop.eup %2584 }
 0x33f   :  { %v488_v45 = vmul.f32 %v2585_v44, %v2583_v43  ;;  %v235_v44 = vadd.f32 %v234_v50, %v3198_v35 }
 0x341   :  { %v489_v46 = vpack.c.bf16 %v488_v45, %v488_v45  ;;  %2415 = vmatmul.mubr.msk.f32.vlgmr.msra.gmra.mxu0 %vm273_vm1, %v488_v45 }
 0x342   :  { %759 = vmatpush1.msra.mxu0 %v3049_v4  ;;  %806 = vmatprep.mubr.f32.mxu0 %v2936_v2 }
 0x343   :  { %490 = vst.msk [vmem:[#allocation2 + $0x4] sm:$0xf] %vm373_vm2, %v489_v46  ;;  %760 = vmatprep.subr.mxu0 %v3054_v5 }
 0x344   :  { %761 = vmatpush1.msra.mxu0 %v3060_v6 }
 0x345   :  { %762 = vmatprep.subr.mxu0 %v3069_v8 }
 0x346   :  { %763 = vmatpush1.msra.mxu0 %v3078_v10 }
 0x347   :  { %764 = vmatprep.subr.mxu0 %v3084_v11 }
 0x348   :  { %765 = vmatpush1.msra.mxu0 %v3096_v14 }
 0x349   :  { %766 = vmatprep.subr.mxu0 %v3102_v16 }
 0x34a   :  { %767 = vmatpush1.msra.mxu0 %v3107_v17 }
 0x34b   :  { %768 = vmatprep.subr.mxu0 %v3114_v18 }
 0x34c   :  { %769 = vmatpush1.msra.mxu0 %v3119_v19 }
 0x34d   :  { %770 = vmatprep.subr.mxu0 %v3126_v20 }
 0x34e   :  { %771 = vmatpush1.msra.mxu0 %v3132_v21 }
 0x34f   :  { %772 = vmatprep.subr.mxu0 %v3139_v22 }
 0x350   :  { %773 = vmatpush1.msra.mxu0 %v3146_v23 }
 0x351   :  { %990 = vmatprep.subr.mxu0 %v3044_v3  ;;  %v229_v3 = vadd.f32 %v228_v47, %v3192_v28 }
 0x401   :  { %v576_v59 = vpop.f32.mrf.mxu0 }
 0x402   :  { %v581_v60 = vadd.f32 %v576_v59, %v229_v3 }
 0x403   :  { %v578_v62 = vpop.f32.mrf.mxu0 }
 0x404   :  { %v2416_v61 = vmul.f32 -1.442695, %v581_v60  ;;  %v582_v0 = vadd.f32 %v578_v62, %v231_v63 }
 0x406   :  { %2586 = vpow2.f32 %v2416_v61  ;;  %v2417_v24 = vmul.f32 -1.442695, %v582_v0 }
 0x407   :  { %2588 = vtanh.f32 %v582_v0 }
 0x413   :  { %v2587_v7 = vpop.eup %2586 }
 0x414   :  { %v589_v9 = vadd.f32 1.0, %v2587_v7  ;;  %v2589_v12 = vpop.eup %2588 }
 0x416   :  { %2590 = vrcp.f32 %v589_v9 }
 0x417   :  { %2592 = vpow2.f32 %v2417_v24 }
 0x423   :  { %v2591_v13 = vpop.eup %2590 }
 0x424   :  { %v597_v15 = vmul.f32 %v2591_v13, %v2589_v12  ;;  %v2593_v27 = vpop.eup %2592  ;;  %v596_v30 = vmul.f32 %v2591_v13, %v486_v42 }
 0x425   :  { %v590_v29 = vadd.f32 1.0, %v2593_v27 }
 0x426   :  { %599 = vrot.lane.b32.xlu1 %v597_v15, %s2928_s19 }
 0x427   :  { %2594 = vrcp.f32 %v590_v29 }
 0x434   :  { %v2595_v33 = vpop.eup %2594 }
 0x498   :  { %v600_v31 = vpop.permute.xlu1 %599 }
 0x499   :  { %v602_v32 = vadd.f32 %v600_v31, %v596_v30 }
 0x49b   :  { %2596 = vtanh.f32 %v602_v32 }
 0x4a8   :  { %v2597_v36 = vpop.eup %2596 }
 0x4a9   :  { %v604_v37 = vmul.f32 %v2597_v36, %v2595_v33 }
 0x4ab   :  { %v605_v38 = vpack.c.bf16 %v604_v37, %v604_v37  ;;  %2418 = vmatmul.mubr.msk.f32.vlgmr.msra.gmra.mxu1 %vm273_vm1, %v604_v37 }
 0x4ac   :  { %875 = vmatpush1.msra.mxu1 %v3049_v4  ;;  %922 = vmatprep.mubr.f32.mxu1 %v2936_v2 }
 0x4ad   :  { %606 = vst.msk [vmem:[#allocation2 + $0x8] sm:$0xf] %vm373_vm2, %v605_v38  ;;  %876 = vmatprep.subr.mxu1 %v3054_v5 }
 0x4ae   :  { %877 = vmatpush1.msra.mxu1 %v3060_v6 }
 0x4af   :  { %878 = vmatprep.subr.mxu1 %v3069_v8 }
 0x4b0   :  { %879 = vmatpush1.msra.mxu1 %v3078_v10 }
 0x4b1   :  { %880 = vmatprep.subr.mxu1 %v3084_v11 }
 0x4b2   :  { %881 = vmatpush1.msra.mxu1 %v3096_v14 }
 0x4b3   :  { %882 = vmatprep.subr.mxu1 %v3102_v16 }
 0x4b4   :  { %883 = vmatpush1.msra.mxu1 %v3107_v17 }
 0x4b5   :  { %884 = vmatprep.subr.mxu1 %v3114_v18 }
 0x4b6   :  { %885 = vmatpush1.msra.mxu1 %v3119_v19 }
 0x4b7   :  { %886 = vmatprep.subr.mxu1 %v3126_v20 }
 0x4b8   :  { %887 = vmatpush1.msra.mxu1 %v3132_v21 }
 0x4b9   :  { %888 = vmatprep.subr.mxu1 %v3139_v22 }
 0x4ba   :  { %889 = vmatpush1.msra.mxu1 %v3146_v23 }
 0x56b   :  { %v692_v40 = vpop.f32.mrf.mxu1 }
 0x56c   :  { %v697_v41 = vadd.f32 %v692_v40, %v233_v39  ;;  %v243_v40 = vadd.f32 %v3275_v53, %v3192_v28 }
 0x56d   :  { %v694_v43 = vpop.f32.mrf.mxu1 }
 0x56e   :  { %v2419_v42 = vmul.f32 -1.442695, %v697_v41  ;;  %v698_v45 = vadd.f32 %v694_v43, %v235_v44 }
 0x570   :  { %2598 = vpow2.f32 %v2419_v42  ;;  %v2420_v60 = vmul.f32 -1.442695, %v698_v45 }
 0x571   :  { %2600 = vtanh.f32 %v698_v45  ;;  %v245_v45 = vadd.f32 %v3277_v54, %v3198_v35 }
 0x57d   :  { %v2599_v46 = vpop.eup %2598 }
 0x57e   :  { %v705_v47 = vadd.f32 1.0, %v2599_v46  ;;  %v2601_v48 = vpop.eup %2600 }
 0x580   :  { %2602 = vrcp.f32 %v705_v47 }
 0x581   :  { %2604 = vpow2.f32 %v2420_v60 }
 0x58d   :  { %v2603_v3 = vpop.eup %2602 }
 0x58e   :  { %v713_v59 = vmul.f32 %v2603_v3, %v2601_v48  ;;  %v2605_v49 = vpop.eup %2604  ;;  %v712_v62 = vmul.f32 %v2603_v3, %v602_v32  ;;  %v2540_v3 = vld [vmem:[#allocation7 + $0x34] ss:$8 sps:$4 sm:$0xff]  }
 0x58f   :  { %v706_v61 = vadd.f32 1.0, %v2605_v49 }
 0x590   :  { %715 = vrot.lane.b32.xlu1 %v713_v59, %s2928_s19 }
 0x591   :  { %2606 = vrcp.f32 %v706_v61 }
 0x59e   :  { %v2607_v50 = vpop.eup %2606 }
 0x602   :  { %v716_v63 = vpop.permute.xlu1 %715 }
 0x603   :  { %v718_v0 = vadd.f32 %v716_v63, %v712_v62 }
 0x605   :  { %2608 = vtanh.f32 %v718_v0 }
 0x612   :  { %v2609_v7 = vpop.eup %2608 }
 0x613   :  { %v720_v9 = vmul.f32 %v2609_v7, %v2607_v50 }
 0x615   :  { %v721_v12 = vpack.c.bf16 %v720_v9, %v720_v9  ;;  %2421 = vmatmul.mubr.msk.f32.vlgmr.msra.gmra.mxu0 %vm273_vm1, %v720_v9  ;;  %v2538_v9 = vld [vmem:[#allocation7 + $0x30] ss:$8 sps:$4 sm:$0xff]  }
 0x616   :  { %991 = vmatpush1.msra.mxu0 %v3049_v4  ;;  %1038 = vmatprep.mubr.f32.mxu0 %v2936_v2  ;;  %v239_v4 = vadd.f32 %v3271_v51, %v3192_v28 }
 0x617   :  { %722 = vst.msk [vmem:[#allocation2 + $0xc] sm:$0xf] %vm373_vm2, %v721_v12  ;;  %992 = vmatprep.subr.mxu0 %v3054_v5 }
 0x618   :  { %993 = vmatpush1.msra.mxu0 %v3060_v6 }
 0x619   :  { %994 = vmatprep.subr.mxu0 %v3069_v8 }
 0x61a   :  { %995 = vmatpush1.msra.mxu0 %v3078_v10 }
 0x61b   :  { %996 = vmatprep.subr.mxu0 %v3084_v11  ;;  %v241_v11 = vadd.f32 %v3273_v52, %v3198_v35 }
 0x61c   :  { %997 = vmatpush1.msra.mxu0 %v3096_v14 }
 0x61d   :  { %998 = vmatprep.subr.mxu0 %v3102_v16 }
 0x61e   :  { %999 = vmatpush1.msra.mxu0 %v3107_v17 }
 0x61f   :  { %1000 = vmatprep.subr.mxu0 %v3114_v18 }
 0x620   :  { %1001 = vmatpush1.msra.mxu0 %v3119_v19 }
 0x621   :  { %1002 = vmatprep.subr.mxu0 %v3126_v20 }
 0x622   :  { %1003 = vmatpush1.msra.mxu0 %v3132_v21 }
 0x623   :  { %1004 = vmatprep.subr.mxu0 %v3139_v22 }
 0x624   :  { %1005 = vmatpush1.msra.mxu0 %v3146_v23 }
 0x625   :  { %1295 = vmatprep.subr.bf16.mxu0 %v2540_v3  ;;  %v3469_v3 = vld [vmem:[%s3713_s5 + $0x18] sm:$0xff] }
 0x6d5   :  { %v808_v5 = vpop.f32.mrf.mxu0 }
 0x6d6   :  { %v813_v6 = vadd.f32 %v808_v5, %v239_v4  ;;  %v2543_v4 = vld [vmem:[#allocation7 + $0x24] ss:$8 sps:$4 sm:$0xff]  }
 0x6d7   :  { %v810_v10 = vpop.f32.mrf.mxu0 }
 0x6d8   :  { %v2422_v8 = vmul.f32 -1.442695, %v813_v6  ;;  %v814_v14 = vadd.f32 %v810_v10, %v241_v11  ;;  %v2541_v6 = vld [vmem:[#allocation7 + $0x20] ss:$8 sps:$4 sm:$0xff]   ;;  %v2544_v10 = vld [vmem:[#allocation7 + $0x10] ss:$8 sps:$4 sm:$0xff]  }
 0x6d9   :  { %v2549_v11 = vld [vmem:[#allocation7 + $0x4] ss:$8 sps:$4 sm:$0xff]  }
 0x6da   :  { %2610 = vpow2.f32 %v2422_v8  ;;  %v2423_v30 = vmul.f32 -1.442695, %v814_v14  ;;  %v2546_v8 = vld [vmem:[#allocation7 + $0x14] ss:$8 sps:$4 sm:$0xff]  }
 0x6db   :  { %2612 = vtanh.f32 %v814_v14  ;;  %v2547_v14 = vld [vmem:[#allocation7] ss:$8 sps:$4 sm:$0xff]  }
 0x6e7   :  { %v2611_v13 = vpop.eup %2610 }
 0x6e8   :  { %v821_v15 = vadd.f32 1.0, %v2611_v13  ;;  %v2613_v24 = vpop.eup %2612  ;;  %v2550_v13 = vld [vmem:[#allocation2] sm:$0xff]  }
 0x6ea   :  { %2614 = vrcp.f32 %v821_v15  ;;  %v2551_v15 = vld [vmem:[#allocation2 + $0x8] sm:$0xff]  }
 0x6eb   :  { %2616 = vpow2.f32 %v2423_v30 }
 0x6f7   :  { %v2615_v27 = vpop.eup %2614 }
 0x6f8   :  { %v829_v29 = vmul.f32 %v2615_v27, %v2613_v24  ;;  %v2617_v51 = vpop.eup %2616  ;;  %v828_v32 = vmul.f32 %v2615_v27, %v718_v0  ;;  %v249_v27 = vadd.f32 %v3279_v55, %v3192_v28  ;;  %v1085_v55 = vld [vmem:[%s3710_s2 + $0x70] sm:$0xff] }
 0x6f9   :  { %v822_v31 = vadd.f32 1.0, %v2617_v51 }
 0x6fa   :  { %831 = vrot.lane.b32.xlu0 %v829_v29, %s2928_s19 }
 0x6fb   :  { %2618 = vrcp.f32 %v822_v31 }
 0x708   :  { %v2619_v52 = vpop.eup %2618 }
 0x76c   :  { %v832_v33 = vpop.permute.xlu0 %831 }
 0x76d   :  { %v834_v36 = vadd.f32 %v832_v33, %v828_v32  ;;  %v251_v32 = vadd.f32 %v3281_v56, %v3198_v35  ;;  %v1084_v56 = vld [vmem:[%s3710_s2 + $0x68] sm:$0xff] }
 0x76f   :  { %2620 = vtanh.f32 %v834_v36 }
 0x77c   :  { %v2621_v37 = vpop.eup %2620 }
 0x77d   :  { %v836_v38 = vmul.f32 %v2621_v37, %v2619_v52  ;;  %v1083_v37 = vld [vmem:[%s3710_s2 + $0x60] sm:$0xff] }
 0x77f   :  { %v837_v39 = vpack.c.bf16 %v836_v38, %v836_v38  ;;  %2424 = vmatmul.mubr.msk.f32.vlgmr.msra.gmra.mxu1 %vm273_vm1, %v836_v38  ;;  %v1082_v38 = vld [vmem:[%s3710_s2 + $0x58] sm:$0xff] }
 0x780   :  { %1154 = vmatprep.mubr.f32.mxu1 %v2936_v2 }
 0x781   :  { %838 = vst.msk [vmem:[#allocation2 + $0x10] sm:$0xf] %vm373_vm2, %v837_v39  ;;  %v1081_v39 = vld [vmem:[%s3710_s2 + $0x50] sm:$0xff] }
 0x83f   :  { %v924_v41 = vpop.f32.mrf.mxu1 }
 0x840   :  { %v929_v42 = vadd.f32 %v924_v41, %v243_v40  ;;  %v3382_v40 = vld [vmem:[%s3713_s5 + $0x78] sm:$0xff]  ;;  %v1080_v41 = vld [vmem:[%s3710_s2 + $0x48] sm:$0xff] }
 0x841   :  { %v926_v44 = vpop.f32.mrf.mxu1 }
 0x842   :  { %v2425_v43 = vmul.f32 -1.442695, %v929_v42  ;;  %v930_v46 = vadd.f32 %v926_v44, %v245_v45  ;;  %v1079_v42 = vld [vmem:[%s3710_s2 + $0x40] sm:$0xff] }
 0x844   :  { %2622 = vpow2.f32 %v2425_v43  ;;  %v2426_v53 = vmul.f32 -1.442695, %v930_v46 }
 0x845   :  { %2624 = vtanh.f32 %v930_v46  ;;  %v3451_v46 = vld [vmem:[%s3713_s5 + $0x30] sm:$0xff] }
 0x851   :  { %v2623_v47 = vpop.eup %2622 }
 0x852   :  { %v937_v48 = vadd.f32 1.0, %v2623_v47  ;;  %v2625_v59 = vpop.eup %2624  ;;  %v3457_v47 = vld [vmem:[%s3713_s5 + $0x28] sm:$0xff] }
 0x854   :  { %2626 = vrcp.f32 %v937_v48  ;;  %v3463_v48 = vld [vmem:[%s3713_s5 + $0x20] sm:$0xff] }
 0x855   :  { %2628 = vpow2.f32 %v2426_v53 }
 0x861   :  { %v2627_v60 = vpop.eup %2626 }
 0x862   :  { %v945_v49 = vmul.f32 %v2627_v60, %v2625_v59  ;;  %v2629_v61 = vpop.eup %2628  ;;  %v944_v63 = vmul.f32 %v2627_v60, %v834_v36  ;;  %v3475_v59 = vld [vmem:[%s3713_s5 + $0x10] sm:$0xff]  ;;  %v3481_v60 = vld [vmem:[%s3713_s5 + $0x8] sm:$0xff] }
 0x863   :  { %v938_v62 = vadd.f32 1.0, %v2629_v61 }
 0x864   :  { %947 = vrot.lane.b32.xlu1 %v945_v49, %s2928_s19  ;;  %v3487_v49 = vld [vmem:[%s3713_s5] sm:$0xff] }
 0x865   :  { %2630 = vrcp.f32 %v938_v62 }
 0x872   :  { %v2631_v54 = vpop.eup %2630 }
 0x8d6   :  { %v948_v0 = vpop.permute.xlu1 %947 }
 0x8d7   :  { %v3342_v50 = vadd.f32 %v948_v0, %v944_v63 }
 0x8d9   :  { %2632 = vtanh.f32 %v3342_v50 }
 0x8e6   :  { %v2633_v7 = vpop.eup %2632 }
 0x8e7   :  { %v952_v12 = vmul.f32 %v2633_v7, %v2631_v54 }
 0x8e9   :  { %v953_v5 = vpack.c.bf16 %v952_v12, %v952_v12  ;;  %2427 = vmatmul.mubr.msk.f32.vlgmr.msra.gmra.mxu0 %vm273_vm1, %v952_v12 }
 0x8ea   :  { %1296 = vmatpush1.bf16.msra.mxu0 %v2538_v9  ;;  %1319 = vmatprep.mubr.bf16.mxu0 %v2935_v1 }
 0x8eb   :  { %954 = vst.msk [vmem:[#allocation2 + $0x14] sm:$0xf] %vm373_vm2, %v953_v5  ;;  %1297 = vmatprep.subr.bf16.mxu0 %v2543_v4 }
 0x8ee   :  { %1298 = vmatpush1.bf16.msra.mxu0 %v2541_v6 }
 0x8ef   :  { %1299 = vmatprep.subr.bf16.mxu0 %v2546_v8 }
 0x8f2   :  { %1300 = vmatpush1.bf16.msra.mxu0 %v2544_v10  ;;  %v2552_v24 = vld [vmem:[#allocation2 + $0x10] sm:$0xff]   ;;  %v1203_v10 = vld [vmem:[#allocation9] sm:$0x3] }
 0x8f3   :  { %1301 = vmatprep.subr.bf16.mxu0 %v2549_v11  ;;  %v3538_v11 = vrot.slane %v1203_v10, %v153_v26  ;;  %v3545_v26 = vrot.slane %v1203_v10, %v157_v34 }
 0x8f6   :  { %1302 = vmatpush1.bf16.msra.mxu0 %v2547_v14 }
 0x8f7   :  { %1588 = vmatprep.subr.mxu0 %v3382_v40 }
 0x8f9   :  { %2445 = vmatmul.mubr.msk.bf16.vlgmr.msra.gmra.mxu0 %vm273_vm1, %v2550_v13 }
 0x8fa   :  { %1329 = vmatprep.mubr.bf16.mxu0 %v2935_v1 }
 0x901   :  { %2446 = vmatmul.mubr.msk.bf16.gmra.mxu0 %vm273_vm1, %v2551_v15  ;;  %v255_v15 = vadd.f32 %v3285_v58, %v3198_v35 }
 0x902   :  { %1339 = vmatprep.mubr.bf16.mxu0 %v2935_v1 }
 0x909   :  { %2447 = vmatmul.mubr.msk.bf16.gmra.mxu0 %vm273_vm1, %v2552_v24 }
 0x90a   :  { %1349 = vmatprep.mubr.bf16.mxu0 %v2935_v1  ;;  %v1086_v1 = vld [vmem:[%s3710_s2 + $0x78] sm:$0xff] }
 0x90b   :  { %1106 = vmatprep.subr.mxu1 %v1086_v1 }
 0x90c   :  { %1107 = vmatpush1.msra.mxu1 %v1085_v55 }
 0x90d   :  { %1108 = vmatprep.subr.mxu1 %v1084_v56 }
 0x90e   :  { %1109 = vmatpush1.msra.mxu1 %v1083_v37 }
 0x90f   :  { %1110 = vmatprep.subr.mxu1 %v1082_v38 }
 0x910   :  { %1111 = vmatpush1.msra.mxu1 %v1081_v39 }
 0x911   :  { %1112 = vmatprep.subr.mxu1 %v1080_v41 }
 0x912   :  { %1113 = vmatpush1.msra.mxu1 %v1079_v42 }
 0x913   :  { %1114 = vmatprep.subr.mxu1 %v3102_v16  ;;  %v3404_v16 = vld [vmem:[%s3713_s5 + $0x70] sm:$0xff] }
 0x914   :  { %1115 = vmatpush1.msra.mxu1 %v3107_v17  ;;  %v3409_v17 = vld [vmem:[%s3713_s5 + $0x68] sm:$0xff]  ;;  %1589 = vmatpush1.msra.mxu0 %v3404_v16 }
 0x915   :  { %1116 = vmatprep.subr.mxu1 %v3114_v18  ;;  %v3415_v18 = vld [vmem:[%s3713_s5 + $0x60] sm:$0xff]  ;;  %1590 = vmatprep.subr.mxu0 %v3409_v17 }
 0x916   :  { %1117 = vmatpush1.msra.mxu1 %v3119_v19  ;;  %v3421_v19 = vld [vmem:[%s3713_s5 + $0x58] sm:$0xff]  ;;  %1591 = vmatpush1.msra.mxu0 %v3415_v18 }
 0x917   :  { %1118 = vmatprep.subr.mxu1 %v3126_v20  ;;  %v3427_v20 = vld [vmem:[%s3713_s5 + $0x50] sm:$0xff]  ;;  %1592 = vmatprep.subr.mxu0 %v3421_v19 }
 0x918   :  { %1119 = vmatpush1.msra.mxu1 %v3132_v21  ;;  %v3433_v21 = vld [vmem:[%s3713_s5 + $0x48] sm:$0xff]  ;;  %1593 = vmatpush1.msra.mxu0 %v3427_v20 }
 0x919   :  { %1120 = vmatprep.subr.mxu1 %v3139_v22  ;;  %v3439_v22 = vld [vmem:[%s3713_s5 + $0x40] sm:$0xff]  ;;  %1594 = vmatprep.subr.mxu0 %v3433_v21 }
 0x91a   :  { %1121 = vmatpush1.msra.mxu1 %v3146_v23  ;;  %v3445_v23 = vld [vmem:[%s3713_s5 + $0x38] sm:$0xff]  ;;  %1595 = vmatpush1.msra.mxu0 %v3439_v22 }
 0x91b   :  { %1392 = vmatprep.subr.mxu1 %v3382_v40  ;;  %1596 = vmatprep.subr.mxu0 %v3445_v23 }
 0x91c   :  { %1597 = vmatpush1.msra.mxu0 %v3451_v46 }
 0x91d   :  { %1598 = vmatprep.subr.mxu0 %v3457_v47 }
 0x91e   :  { %1599 = vmatpush1.msra.mxu0 %v3463_v48 }
 0x91f   :  { %1600 = vmatprep.subr.mxu0 %v3469_v3 }
 0x920   :  { %1601 = vmatpush1.msra.mxu0 %v3475_v59 }
 0x921   :  { %1602 = vmatprep.subr.mxu0 %v3481_v60 }
 0x922   :  { %1603 = vmatpush1.msra.mxu0 %v3487_v49 }
 0x923   :  { %1784 = vmatprep.subr.mxu0 %v3382_v40 }
 0x9a9   :  { %v1040_v29 = vpop.f32.mrf.mxu0 }
 0x9aa   :  { %v1045_v30 = vadd.f32 %v1040_v29, %v249_v27 }
 0x9ab   :  { %v1042_v31 = vpop.f32.mrf.mxu0 }
 0x9ac   :  { %v2428_v51 = vmul.f32 -1.442695, %v1045_v30  ;;  %v3358_v33 = vadd.f32 %v1042_v31, %v251_v32 }
 0x9ae   :  { %2634 = vpow2.f32 %v2428_v51  ;;  %v2429_v53 = vmul.f32 -1.442695, %v3358_v33 }
 0x9af   :  { %2636 = vtanh.f32 %v3358_v33 }
 0x9b9   :  { %v1321_v14 = vpop.f32.mrf.mxu0 }
 0x9ba   :  { %v1322_v24 = vadd.f32 %v1321_v14, %v3538_v11 }
 0x9bb   :  { %v2635_v36 = vpop.eup %2634  ;;  %v1323_v31 = vpop.f32.mrf.mxu0 }
 0x9bc   :  { %v1053_v52 = vadd.f32 1.0, %v2635_v36  ;;  %v2637_v43 = vpop.eup %2636  ;;  %v1324_v33 = vadd.f32 %v1323_v31, %v3545_v26 }
 0x9be   :  { %2638 = vrcp.f32 %v1053_v52 }
 0x9bf   :  { %2640 = vpow2.f32 %v2429_v53 }
 0x9cb   :  { %v2639_v44 = vpop.eup %2638 }
 0x9cc   :  { %v1061_v45 = vmul.f32 %v2639_v44, %v2637_v43  ;;  %v2641_v61 = vpop.eup %2640  ;;  %v1060_v63 = vmul.f32 %v2639_v44, %v3342_v50  ;;  %v253_v50 = vadd.f32 %v3283_v57, %v3192_v28 }
 0x9cd   :  { %v1054_v62 = vadd.f32 1.0, %v2641_v61 }
 0x9ce   :  { %1063 = vrot.lane.b32.xlu0 %v1061_v45, %s2928_s19 }
 0x9cf   :  { %2642 = vrcp.f32 %v1054_v62 }
 0x9dc   :  { %v2643_v7 = vpop.eup %2642 }
 0xa40   :  { %v1064_v0 = vpop.permute.xlu0 %1063 }
 0xa41   :  { %v3494_v54 = vadd.f32 %v1064_v0, %v1060_v63 }
 0xa43   :  { %2644 = vtanh.f32 %v3494_v54 }
 0xa50   :  { %v2645_v9 = vpop.eup %2644 }
 0xa51   :  { %v1068_v12 = vmul.f32 %v2645_v9, %v2643_v7 }
 0xa53   :  { %v1069_v4 = vpack.c.bf16 %v1068_v12, %v1068_v12  ;;  %2430 = vmatmul.mubr.msk.f32.vlgmr.msra.gmra.mxu1 %vm273_vm1, %v1068_v12 }
 0xa54   :  { %1393 = vmatpush1.msra.mxu1 %v3404_v16  ;;  %1440 = vmatprep.mubr.f32.mxu1 %v2936_v2 }
 0xa55   :  { %1070 = vst.msk [vmem:[#allocation2 + $0x18] sm:$0xf] %vm373_vm2, %v1069_v4  ;;  %1394 = vmatprep.subr.mxu1 %v3409_v17 }
 0xa56   :  { %1395 = vmatpush1.msra.mxu1 %v3415_v18 }
 0xa57   :  { %1396 = vmatprep.subr.mxu1 %v3421_v19 }
 0xa58   :  { %1397 = vmatpush1.msra.mxu1 %v3427_v20 }
 0xa59   :  { %1398 = vmatprep.subr.mxu1 %v3433_v21 }
 0xa5a   :  { %1399 = vmatpush1.msra.mxu1 %v3439_v22 }
 0xa5b   :  { %1400 = vmatprep.subr.mxu1 %v3445_v23 }
 0xa5c   :  { %1401 = vmatpush1.msra.mxu1 %v3451_v46 }
 0xa5d   :  { %1402 = vmatprep.subr.mxu1 %v3457_v47 }
 0xa5e   :  { %1403 = vmatpush1.msra.mxu1 %v3463_v48 }
 0xa5f   :  { %1404 = vmatprep.subr.mxu1 %v3469_v3 }
 0xa60   :  { %1405 = vmatpush1.msra.mxu1 %v3475_v59 }
 0xa61   :  { %1406 = vmatprep.subr.mxu1 %v3481_v60 }
 0xa62   :  { %1407 = vmatpush1.msra.mxu1 %v3487_v49 }
 0xa63   :  { %1441 = vmatmul.mubr.f32.vlgmr.msra.gmra.mxu1 %v2936_v2  ;;  %1490 = vmatprep.subr.mxu1 %v3382_v40 }
 0xa64   :  { %1491 = vmatpush1.msra.mxu1 %v3404_v16  ;;  %1538 = vmatprep.mubr.f32.mxu1 %v2936_v2 }
 0xa65   :  { %1492 = vmatprep.subr.mxu1 %v3409_v17 }
 0xa66   :  { %1493 = vmatpush1.msra.mxu1 %v3415_v18 }
 0xa67   :  { %1494 = vmatprep.subr.mxu1 %v3421_v19 }
 0xa68   :  { %1495 = vmatpush1.msra.mxu1 %v3427_v20 }
 0xa69   :  { %1496 = vmatprep.subr.mxu1 %v3433_v21 }
 0xa6a   :  { %1497 = vmatpush1.msra.mxu1 %v3439_v22 }
 0xa6b   :  { %1498 = vmatprep.subr.mxu1 %v3445_v23 }
 0xa6c   :  { %1499 = vmatpush1.msra.mxu1 %v3451_v46 }
 0xa6d   :  { %1500 = vmatprep.subr.mxu1 %v3457_v47 }
 0xa6e   :  { %1501 = vmatpush1.msra.mxu1 %v3463_v48 }
 0xa6f   :  { %1502 = vmatprep.subr.mxu1 %v3469_v3 }
 0xa70   :  { %1503 = vmatpush1.msra.mxu1 %v3475_v59 }
 0xa71   :  { %1504 = vmatprep.subr.mxu1 %v3481_v60 }
 0xa72   :  { %1505 = vmatpush1.msra.mxu1 %v3487_v49 }
 0xa73   :  { %1686 = vmatprep.subr.mxu1 %v3382_v40 }
 0xb13   :  { %v1156_v5 = vpop.f32.mrf.mxu1 }
 0xb14   :  { %v1161_v6 = vadd.f32 %v1156_v5, %v253_v50 }
 0xb15   :  { %v1158_v13 = vpop.f32.mrf.mxu1 }
 0xb16   :  { %v2431_v8 = vmul.f32 -1.442695, %v1161_v6  ;;  %v1162_v27 = vadd.f32 %v1158_v13, %v255_v15  ;;  %v1325_v6 = vpop.f32.mrf.mxu0 }
 0xb18   :  { %2646 = vpow2.f32 %v2431_v8  ;;  %v2432_v25 = vmul.f32 -1.442695, %v1162_v27  ;;  %v1326_v8 = vadd.f32 %v1325_v6, %v3538_v11  ;;  %v1327_v15 = vpop.f32.mrf.mxu0 }
 0xb19   :  { %2648 = vtanh.f32 %v1162_v27  ;;  %v1328_v27 = vadd.f32 %v1327_v15, %v3545_v26 }
 0xb23   :  { %v1442_v29 = vpop.f32.mrf.mxu1 }
 0xb24   :  { %v1447_v30 = vadd.f32 %v1442_v29, %v1322_v24 }
 0xb25   :  { %v2647_v28 = vpop.eup %2646  ;;  %v1444_v32 = vpop.f32.mrf.mxu1 }
 0xb26   :  { %v1169_v57 = vadd.f32 1.0, %v2647_v28  ;;  %v2449_v51 = vmul.f32 -1.442695, %v1447_v30  ;;  %v2649_v35 = vpop.eup %2648  ;;  %v1448_v58 = vadd.f32 %v1444_v32, %v1324_v33 }
 0xb28   :  { %2650 = vrcp.f32 %v1169_v57  ;;  %v2450_v39 = vmul.f32 -1.442695, %v1448_v58 }
 0xb29   :  { %2652 = vpow2.f32 %v2449_v51 }
 0xb2a   :  { %2654 = vtanh.f32 %v1448_v58 }
 0xb35   :  { %v2651_v36 = vpop.eup %2650 }
 0xb36   :  { %v2653_v52 = vpop.eup %2652  ;;  %v1177_v1 = vmul.f32 %v2651_v36, %v2649_v35  ;;  %v1176_v42 = vmul.f32 %v2651_v36, %v3494_v54 }
 0xb37   :  { %v1455_v55 = vadd.f32 1.0, %v2653_v52  ;;  %v2655_v56 = vpop.eup %2654 }
 0xb38   :  { %1179 = vrot.lane.b32.xlu0 %v1177_v1, %s2928_s19 }
 0xb39   :  { %2656 = vrcp.f32 %v1455_v55 }
 0xb3a   :  { %2658 = vpow2.f32 %v2432_v25 }
 0xb3b   :  { %2660 = vpow2.f32 %v2450_v39 }
 0xb46   :  { %v2657_v37 = vpop.eup %2656 }
 0xb47   :  { %v1463_v38 = vmul.f32 %v2657_v37, %v2655_v56  ;;  %v2659_v34 = vpop.eup %2658  ;;  %v1462_v63 = vmul.f32 0.0, %v2657_v37  ;;  %v1331_v37 = vpop.f32.mrf.mxu0 }
 0xb48   :  { %v1170_v41 = vadd.f32 1.0, %v2659_v34  ;;  %v2661_v45 = vpop.eup %2660 }
 0xb49   :  { %1465 = vrot.lane.b32.xlu1 %v1463_v38, %s2928_s19  ;;  %v1456_v61 = vadd.f32 1.0, %v2661_v45  ;;  %v1333_v38 = vpop.f32.mrf.mxu0 }
 0xb4a   :  { %2662 = vrcp.f32 %v1170_v41 }
 0xb4b   :  { %v1335_v25 = vpop.f32.mrf.mxu0 }
 0xb4d   :  { %v1337_v34 = vpop.f32.mrf.mxu0 }
 0xb4f   :  { %v3593_v39 = vpop.f32.mrf.mxu0 }
 0xb51   :  { %v3595_v41 = vpop.f32.mrf.mxu0 }
 0xb57   :  { %v2663_v53 = vpop.eup %2662 }
 0xbaa   :  { %v1180_v43 = vpop.permute.xlu0 %1179 }
 0xbab   :  { %v1182_v44 = vadd.f32 %v1180_v43, %v1176_v42  ;;  %v3597_v42 = vpop.f32.mrf.mxu0 }
 0xbad   :  { %2664 = vtanh.f32 %v1182_v44  ;;  %v3599_v43 = vpop.f32.mrf.mxu0 }
 0xbae   :  { %2666 = vrcp.f32 %v1456_v61 }
 0xbba   :  { %v2665_v62 = vpop.eup %2664 }
 0xbbb   :  { %v1184_v0 = vmul.f32 %v2665_v62, %v2663_v53  ;;  %v1466_v7 = vpop.permute.xlu1 %1465  ;;  %v2667_v54 = vpop.eup %2666  ;;  %v1332_v62 = vadd.f32 %v1331_v37, %v3538_v11 }
 0xbbc   :  { %v1468_v9 = vadd.f32 %v1466_v7, %v1462_v63 }
 0xbbd   :  { %v1185_v12 = vpack.c.bf16 %v1184_v0, %v1184_v0 }
 0xbbe   :  { %2668 = vtanh.f32 %v1468_v9 }
 0xbbf   :  { %1186 = vst.msk [vmem:[#allocation2 + $0x1c] sm:$0xf] %vm373_vm2, %v1185_v12  ;;  %v1334_v12 = vadd.f32 %v1333_v38, %v3545_v26 }
 0xbc6   :  { %v2553_v4 = vld [vmem:[#allocation2 + $0x18] sm:$0xff]  }
 0xbc7   :  { %2448 = vmatmul.mubr.msk.bf16.gmra.mxu0 %vm273_vm1, %v2553_v4 }
 0xbc8   :  { %1636 = vmatprep.mubr.f32.mxu0 %v2936_v2 }
 0xbcb   :  { %v2669_v50 = vpop.eup %2668 }
 0xbcc   :  { %v1470_v5 = vmul.f32 %v2669_v50, %v2667_v54 }
 0xbce   :  { %2451 = vmatmul.mubr.msk.f32.vlgmr.msra.gmra.mxu1 %vm273_vm1, %v1470_v5 }
 0xbcf   :  { %1687 = vmatpush1.msra.mxu1 %v3404_v16  ;;  %1734 = vmatprep.mubr.f32.mxu1 %v2936_v2 }
 0xbd0   :  { %1688 = vmatprep.subr.mxu1 %v3409_v17 }
 0xbd1   :  { %1689 = vmatpush1.msra.mxu1 %v3415_v18 }
 0xbd2   :  { %1690 = vmatprep.subr.mxu1 %v3421_v19 }
 0xbd3   :  { %1691 = vmatpush1.msra.mxu1 %v3427_v20 }
 0xbd4   :  { %1692 = vmatprep.subr.mxu1 %v3433_v21 }
 0xbd5   :  { %1693 = vmatpush1.msra.mxu1 %v3439_v22 }
 0xbd6   :  { %1694 = vmatprep.subr.mxu1 %v3445_v23 }
 0xbd7   :  { %1695 = vmatpush1.msra.mxu1 %v3451_v46 }
 0xbd8   :  { %1696 = vmatprep.subr.mxu1 %v3457_v47 }
 0xbd9   :  { %1697 = vmatpush1.msra.mxu1 %v3463_v48 }
 0xbda   :  { %1698 = vmatprep.subr.mxu1 %v3469_v3 }
 0xbdb   :  { %1699 = vmatpush1.msra.mxu1 %v3475_v59 }
 0xbdc   :  { %1700 = vmatprep.subr.mxu1 %v3481_v60 }
 0xbdd   :  { %1701 = vmatpush1.msra.mxu1 %v3487_v49 }
 0xbde   :  { %1882 = vmatprep.subr.mxu1 %v3382_v40 }
 0xc87   :  { %v3601_v44 = vpop.f32.mrf.mxu0 }
 0xc89   :  { %v3603_v45 = vpop.f32.mrf.mxu0 }
 0xc8b   :  { %v3605_v53 = vpop.f32.mrf.mxu0 }
 0xc8d   :  { %v3607_v61 = vpop.f32.mrf.mxu0 }
 0xc8e   :  { %v1540_v10 = vpop.f32.mrf.mxu1 }
 0xc8f   :  { %v1545_v14 = vadd.f32 %v1540_v10, %v1326_v8 }
 0xc90   :  { %v1542_v24 = vpop.f32.mrf.mxu1 }
 0xc91   :  { %v2452_v13 = vmul.f32 -1.442695, %v1545_v14  ;;  %v1546_v29 = vadd.f32 %v1542_v24, %v1328_v27 }
 0xc93   :  { %2670 = vpow2.f32 %v2452_v13  ;;  %v2453_v32 = vmul.f32 -1.442695, %v1546_v29 }
 0xc94   :  { %2672 = vtanh.f32 %v1546_v29 }
 0xca0   :  { %v2671_v30 = vpop.eup %2670 }
 0xca1   :  { %v1553_v28 = vadd.f32 1.0, %v2671_v30  ;;  %v2673_v57 = vpop.eup %2672 }
 0xca3   :  { %2674 = vrcp.f32 %v1553_v28 }
 0xca4   :  { %2676 = vpow2.f32 %v2453_v32 }
 0xcb0   :  { %v2675_v51 = vpop.eup %2674 }
 0xcb1   :  { %v1561_v31 = vmul.f32 %v2675_v51, %v2673_v57  ;;  %v2677_v33 = vpop.eup %2676  ;;  %v1560_v58 = vmul.f32 %v2675_v51, %v1468_v9  ;;  %v1336_v57 = vadd.f32 %v1335_v25, %v3538_v11 }
 0xcb2   :  { %v1554_v35 = vadd.f32 1.0, %v2677_v33 }
 0xcb3   :  { %1563 = vrot.lane.b32.xlu1 %v1561_v31, %s2928_s19 }
 0xcb4   :  { %2678 = vrcp.f32 %v1554_v35  ;;  %v1338_v35 = vadd.f32 %v1337_v34, %v3545_v26 }
 0xcc1   :  { %v2679_v1 = vpop.eup %2678 }
 0xd25   :  { %v1564_v36 = vpop.permute.xlu1 %1563 }
 0xd26   :  { %v1566_v52 = vadd.f32 %v1564_v36, %v1560_v58 }
 0xd28   :  { %2680 = vtanh.f32 %v1566_v52 }
 0xd35   :  { %v2681_v55 = vpop.eup %2680 }
 0xd36   :  { %v1568_v56 = vmul.f32 %v2681_v55, %v2679_v1 }
 0xd38   :  { %2454 = vmatmul.mubr.msk.f32.vlgmr.msra.gmra.mxu0 %vm273_vm1, %v1568_v56 }
 0xd39   :  { %1785 = vmatpush1.msra.mxu0 %v3404_v16  ;;  %1832 = vmatprep.mubr.f32.mxu0 %v2936_v2 }
 0xd3a   :  { %1786 = vmatprep.subr.mxu0 %v3409_v17 }
 0xd3b   :  { %1787 = vmatpush1.msra.mxu0 %v3415_v18 }
 0xd3c   :  { %1788 = vmatprep.subr.mxu0 %v3421_v19 }
 0xd3d   :  { %1789 = vmatpush1.msra.mxu0 %v3427_v20 }
 0xd3e   :  { %1790 = vmatprep.subr.mxu0 %v3433_v21 }
 0xd3f   :  { %1791 = vmatpush1.msra.mxu0 %v3439_v22 }
 0xd40   :  { %1792 = vmatprep.subr.mxu0 %v3445_v23 }
 0xd41   :  { %1793 = vmatpush1.msra.mxu0 %v3451_v46 }
 0xd42   :  { %1794 = vmatprep.subr.mxu0 %v3457_v47 }
 0xd43   :  { %1795 = vmatpush1.msra.mxu0 %v3463_v48 }
 0xd44   :  { %1796 = vmatprep.subr.mxu0 %v3469_v3 }
 0xd45   :  { %1797 = vmatpush1.msra.mxu0 %v3475_v59 }
 0xd46   :  { %1798 = vmatprep.subr.mxu0 %v3481_v60 }
 0xd47   :  { %1799 = vmatpush1.msra.mxu0 %v3487_v49 }
 0xd48   :  { %1980 = vmatprep.subr.mxu0 %v3382_v40 }
 0xdf8   :  { %v1638_v63 = vpop.f32.mrf.mxu0 }
 0xdf9   :  { %v1643_v0 = vadd.f32 %v1638_v63, %v1332_v62 }
 0xdfa   :  { %v1640_v9 = vpop.f32.mrf.mxu0 }
 0xdfb   :  { %v2455_v7 = vmul.f32 -1.442695, %v1643_v0  ;;  %v1644_v4 = vadd.f32 %v1640_v9, %v1334_v12  ;;  %v1342_v9 = vadd.f32 %v3593_v39, %v3538_v11 }
 0xdfd   :  { %2682 = vpow2.f32 %v2455_v7  ;;  %v2456_v10 = vmul.f32 -1.442695, %v1644_v4 }
 0xdfe   :  { %2684 = vtanh.f32 %v1644_v4 }
 0xe0a   :  { %v2683_v54 = vpop.eup %2682 }
 0xe0b   :  { %v1651_v50 = vadd.f32 1.0, %v2683_v54  ;;  %v2685_v5 = vpop.eup %2684 }
 0xe0d   :  { %2686 = vrcp.f32 %v1651_v50 }
 0xe0e   :  { %2688 = vpow2.f32 %v2456_v10 }
 0xe1a   :  { %v2687_v6 = vpop.eup %2686 }
 0xe1b   :  { %v1659_v8 = vmul.f32 %v2687_v6, %v2685_v5  ;;  %v2689_v14 = vpop.eup %2688  ;;  %v1658_v15 = vmul.f32 %v2687_v6, %v1566_v52  ;;  %v1344_v5 = vadd.f32 %v3595_v41, %v3545_v26 }
 0xe1c   :  { %v1652_v13 = vadd.f32 1.0, %v2689_v14 }
 0xe1d   :  { %1661 = vrot.lane.b32.xlu0 %v1659_v8, %s2928_s19 }
 0xe1e   :  { %2690 = vrcp.f32 %v1652_v13 }
 0xe2b   :  { %v2691_v29 = vpop.eup %2690 }
 0xe8f   :  { %v1662_v24 = vpop.permute.xlu0 %1661 }
 0xe90   :  { %v1664_v27 = vadd.f32 %v1662_v24, %v1658_v15 }
 0xe92   :  { %2692 = vtanh.f32 %v1664_v27 }
 0xe9f   :  { %v2693_v30 = vpop.eup %2692 }
 0xea0   :  { %v1666_v28 = vmul.f32 %v2693_v30, %v2691_v29 }
 0xea2   :  { %2457 = vmatmul.mubr.msk.f32.vlgmr.msra.gmra.mxu1 %vm273_vm1, %v1666_v28 }
 0xea3   :  { %1883 = vmatpush1.msra.mxu1 %v3404_v16  ;;  %1930 = vmatprep.mubr.f32.mxu1 %v2936_v2 }
 0xea4   :  { %1884 = vmatprep.subr.mxu1 %v3409_v17 }
 0xea5   :  { %1885 = vmatpush1.msra.mxu1 %v3415_v18 }
 0xea6   :  { %1886 = vmatprep.subr.mxu1 %v3421_v19 }
 0xea7   :  { %1887 = vmatpush1.msra.mxu1 %v3427_v20 }
 0xea8   :  { %1888 = vmatprep.subr.mxu1 %v3433_v21 }
 0xea9   :  { %1889 = vmatpush1.msra.mxu1 %v3439_v22 }
 0xeaa   :  { %1890 = vmatprep.subr.mxu1 %v3445_v23 }
 0xeab   :  { %1891 = vmatpush1.msra.mxu1 %v3451_v46 }
 0xeac   :  { %1892 = vmatprep.subr.mxu1 %v3457_v47 }
 0xead   :  { %1893 = vmatpush1.msra.mxu1 %v3463_v48 }
 0xeae   :  { %1894 = vmatprep.subr.mxu1 %v3469_v3 }
 0xeaf   :  { %1895 = vmatpush1.msra.mxu1 %v3475_v59 }
 0xeb0   :  { %1896 = vmatprep.subr.mxu1 %v3481_v60 }
 0xeb1   :  { %1897 = vmatpush1.msra.mxu1 %v3487_v49 }
 0xeb2   :  { %2078 = vmatprep.subr.mxu1 %v3382_v40 }
 0xf62   :  { %v1736_v51 = vpop.f32.mrf.mxu1 }
 0xf63   :  { %v1741_v31 = vadd.f32 %v1736_v51, %v1336_v57 }
 0xf64   :  { %v1738_v33 = vpop.f32.mrf.mxu1 }
 0xf65   :  { %v2458_v32 = vmul.f32 -1.442695, %v1741_v31  ;;  %v1742_v58 = vadd.f32 %v1738_v33, %v1338_v35 }
 0xf67   :  { %2694 = vpow2.f32 %v2458_v32  ;;  %v2459_v40 = vmul.f32 -1.442695, %v1742_v58 }
 0xf68   :  { %2696 = vtanh.f32 %v1742_v58  ;;  %v1352_v58 = vadd.f32 %v3601_v44, %v3538_v11 }
 0xf74   :  { %v2695_v36 = vpop.eup %2694 }
 0xf75   :  { %v1749_v52 = vadd.f32 1.0, %v2695_v36  ;;  %v2697_v1 = vpop.eup %2696 }
 0xf77   :  { %2698 = vrcp.f32 %v1749_v52 }
 0xf78   :  { %2700 = vpow2.f32 %v2459_v40 }
 0xf84   :  { %v2699_v55 = vpop.eup %2698 }
 0xf85   :  { %v1757_v56 = vmul.f32 %v2699_v55, %v2697_v1  ;;  %v2701_v37 = vpop.eup %2700  ;;  %v1756_v25 = vmul.f32 %v2699_v55, %v1664_v27 }
 0xf86   :  { %v1750_v38 = vadd.f32 1.0, %v2701_v37 }
 0xf87   :  { %1759 = vrot.lane.b32.xlu1 %v1757_v56, %s2928_s19  ;;  %v1354_v56 = vadd.f32 %v3603_v45, %v3545_v26 }
 0xf88   :  { %2702 = vrcp.f32 %v1750_v38 }
 0xf95   :  { %v2703_v34 = vpop.eup %2702 }
 0xff9   :  { %v1760_v62 = vpop.permute.xlu1 %1759 }
 0xffa   :  { %v1762_v63 = vadd.f32 %v1760_v62, %v1756_v25 }
 0xffc   :  { %2704 = vtanh.f32 %v1762_v63 }
0x1009   :  { %v2705_v0 = vpop.eup %2704 }
0x100a   :  { %v1764_v7 = vmul.f32 %v2705_v0, %v2703_v34 }
0x100c   :  { %2460 = vmatmul.mubr.msk.f32.vlgmr.msra.gmra.mxu0 %vm273_vm1, %v1764_v7 }
0x100d   :  { %1981 = vmatpush1.msra.mxu0 %v3404_v16  ;;  %2028 = vmatprep.mubr.f32.mxu0 %v2936_v2 }
0x100e   :  { %1982 = vmatprep.subr.mxu0 %v3409_v17 }
0x100f   :  { %1983 = vmatpush1.msra.mxu0 %v3415_v18 }
0x1010   :  { %1984 = vmatprep.subr.mxu0 %v3421_v19 }
0x1011   :  { %1985 = vmatpush1.msra.mxu0 %v3427_v20 }
0x1012   :  { %1986 = vmatprep.subr.mxu0 %v3433_v21 }
0x1013   :  { %1987 = vmatpush1.msra.mxu0 %v3439_v22 }
0x1014   :  { %1988 = vmatprep.subr.mxu0 %v3445_v23 }
0x1015   :  { %1989 = vmatpush1.msra.mxu0 %v3451_v46 }
0x1016   :  { %1990 = vmatprep.subr.mxu0 %v3457_v47 }
0x1017   :  { %1991 = vmatpush1.msra.mxu0 %v3463_v48 }
0x1018   :  { %1992 = vmatprep.subr.mxu0 %v3469_v3 }
0x1019   :  { %1993 = vmatpush1.msra.mxu0 %v3475_v59 }
0x101a   :  { %1994 = vmatprep.subr.mxu0 %v3481_v60 }
0x101b   :  { %1995 = vmatpush1.msra.mxu0 %v3487_v49 }
0x101c   :  { %2496 = vmatprep.subr.bf16.mxu0 %v2936_v2 }
0x10cc   :  { %v1834_v12 = vpop.f32.mrf.mxu0 }
0x10cd   :  { %v1839_v4 = vadd.f32 %v1834_v12, %v1342_v9 }
0x10ce   :  { %v1836_v50 = vpop.f32.mrf.mxu0 }
0x10cf   :  { %v2461_v54 = vmul.f32 -1.442695, %v1839_v4  ;;  %v1840_v6 = vadd.f32 %v1836_v50, %v1344_v5  ;;  %v1356_v50 = vadd.f32 %v3605_v53, %v3538_v11  ;;  %v2556_v53 = vld [vmem:[#allocation10 + $0x8] sm:$0xff]  }
0x10d1   :  { %2706 = vpow2.f32 %v2461_v54  ;;  %v2462_v24 = vmul.f32 -1.442695, %v1840_v6 }
0x10d2   :  { %2708 = vtanh.f32 %v1840_v6 }
0x10de   :  { %v2707_v8 = vpop.eup %2706 }
0x10df   :  { %v1847_v10 = vadd.f32 1.0, %v2707_v8  ;;  %v2709_v14 = vpop.eup %2708 }
0x10e1   :  { %2710 = vrcp.f32 %v1847_v10 }
0x10e2   :  { %2712 = vpow2.f32 %v2462_v24 }
0x10ee   :  { %v2711_v13 = vpop.eup %2710 }
0x10ef   :  { %v1855_v15 = vmul.f32 %v2711_v13, %v2709_v14  ;;  %v2713_v39 = vpop.eup %2712  ;;  %v1854_v29 = vmul.f32 %v2711_v13, %v1762_v63  ;;  %v1358_v14 = vadd.f32 %v3607_v61, %v3545_v26 }
0x10f0   :  { %v1848_v27 = vadd.f32 1.0, %v2713_v39  ;;  %v2554_v39 = vld [vmem:[#allocation10 + $0x18] sm:$0xff]  }
0x10f1   :  { %1857 = vrot.lane.b32.xlu0 %v1855_v15, %s2928_s19 }
0x10f2   :  { %2714 = vrcp.f32 %v1848_v27 }
0x10ff   :  { %v2715_v41 = vpop.eup %2714 }
0x1163   :  { %v1858_v30 = vpop.permute.xlu0 %1857 }
0x1164   :  { %v1860_v28 = vadd.f32 %v1858_v30, %v1854_v29  ;;  %v2557_v29 = vld [vmem:[#allocation10] sm:$0xff]   ;;  %v2558_v30 = vld [vmem:[#allocation12 + $0x18] sm:$0xff]  }
0x1166   :  { %2716 = vtanh.f32 %v1860_v28 }
0x1173   :  { %v2717_v57 = vpop.eup %2716 }
0x1174   :  { %v1862_v51 = vmul.f32 %v2717_v57, %v2715_v41 }
0x1176   :  { %2463 = vmatmul.mubr.msk.f32.vlgmr.msra.gmra.mxu1 %vm273_vm1, %v1862_v51 }
0x1177   :  { %2079 = vmatpush1.msra.mxu1 %v3404_v16  ;;  %2126 = vmatprep.mubr.f32.mxu1 %v2936_v2  ;;  %v1346_v16 = vadd.f32 %v3597_v42, %v3538_v11  ;;  %v2555_v11 = vld [vmem:[#allocation10 + $0x10] sm:$0xff]  }
0x1178   :  { %2080 = vmatprep.subr.mxu1 %v3409_v17 }
0x1179   :  { %2081 = vmatpush1.msra.mxu1 %v3415_v18 }
0x117a   :  { %2082 = vmatprep.subr.mxu1 %v3421_v19 }
0x117b   :  { %2083 = vmatpush1.msra.mxu1 %v3427_v20 }
0x117c   :  { %2084 = vmatprep.subr.mxu1 %v3433_v21  ;;  %v1348_v21 = vadd.f32 %v3599_v43, %v3545_v26 }
0x117d   :  { %2085 = vmatpush1.msra.mxu1 %v3439_v22 }
0x117e   :  { %2086 = vmatprep.subr.mxu1 %v3445_v23 }
0x117f   :  { %2087 = vmatpush1.msra.mxu1 %v3451_v46 }
0x1180   :  { %2088 = vmatprep.subr.mxu1 %v3457_v47 }
0x1181   :  { %2089 = vmatpush1.msra.mxu1 %v3463_v48 }
0x1182   :  { %2090 = vmatprep.subr.mxu1 %v3469_v3 }
0x1183   :  { %2091 = vmatpush1.msra.mxu1 %v3475_v59 }
0x1184   :  { %2092 = vmatprep.subr.mxu1 %v3481_v60 }
0x1185   :  { %2093 = vmatpush1.msra.mxu1 %v3487_v49 }
0x1186   :  { %2508 = vmatprep.subr.bf16.mxu1 %v2936_v2 }
0x1236   :  { %v1932_v17 = vpop.f32.mrf.mxu1 }
0x1237   :  { %v1937_v18 = vadd.f32 %v1932_v17, %v1346_v16 }
0x1238   :  { %v1934_v20 = vpop.f32.mrf.mxu1 }
0x1239   :  { %v2464_v19 = vmul.f32 -1.442695, %v1937_v18  ;;  %v1938_v22 = vadd.f32 %v1934_v20, %v1348_v21 }
0x123b   :  { %2718 = vpow2.f32 %v2464_v19  ;;  %v2465_v59 = vmul.f32 -1.442695, %v1938_v22 }
0x123c   :  { %2720 = vtanh.f32 %v1938_v22 }
0x1248   :  { %v2719_v23 = vpop.eup %2718 }
0x1249   :  { %v1945_v46 = vadd.f32 1.0, %v2719_v23  ;;  %v2721_v47 = vpop.eup %2720  ;;  %v2560_v23 = vld [vmem:[#allocation12 + $0x8] sm:$0xff]  }
0x124b   :  { %2722 = vrcp.f32 %v1945_v46  ;;  %v2561_v46 = vld [vmem:[#allocation12] sm:$0xff]  }
0x124c   :  { %2724 = vpow2.f32 %v2465_v59 }
0x1258   :  { %v2723_v48 = vpop.eup %2722 }
0x1259   :  { %v1953_v3 = vmul.f32 %v2723_v48, %v2721_v47  ;;  %v2725_v60 = vpop.eup %2724  ;;  %v1952_v42 = vmul.f32 %v2723_v48, %v1860_v28  ;;  %v2559_v28 = vld [vmem:[#allocation12 + $0x10] sm:$0xff]   ;;  %v2472_v47 = vld [vmem:[%s3716_s8] ss:$0 sm:$0xff]  ;;  %s2938_s8 = smov [#allocation16]  }
0x125a   :  { %v1946_v49 = vadd.f32 1.0, %v2725_v60  ;;  %s2392_s25 = sshll.u32 %s2938_s8, 4  ;;  %s2393_s25 = int_to_ptr.vmem [resolvable:$true] %s2392_s25 }
0x125b   :  { %1955 = vrot.lane.b32.xlu1 %v1953_v3, %s2928_s19  ;;  %s2894_s6 = scalar_lea.vmem %s2393_s25, 16  ;;  %s2898_s26 = scalar_lea.vmem %s2393_s25, 32 }
0x125c   :  { %2726 = vrcp.f32 %v1946_v49  ;;  %p2895_p7 = scmp.ne.s32.totalorder %s2393_s25, %s2894_s6  ;;  %p2899_p8 = scmp.lt.s32.totalorder %s2393_s25, %s2393_s25 }
0x125d   :  { %p2900_p9 = scmp.lt.s32.totalorder %s2898_s26, %s2894_s6 }
0x125f   :  { %p2901_p10 = por %p2900_p9, %p2899_p8 }
0x1261   :  { %p2902_p11 = pnand %p2901_p10, %p2895_p7 }
0x1269   :  { %v2727_v43 = vpop.eup %2726 }
0x12cd   :  { %v1956_v31 = vpop.permute.xlu1 %1955 }
0x12ce   :  { %v1958_v32 = vadd.f32 %v1956_v31, %v1952_v42 }
0x12d0   :  { %2728 = vtanh.f32 %v1958_v32 }
0x12dd   :  { %v2729_v33 = vpop.eup %2728 }
0x12de   :  { %v1960_v35 = vmul.f32 %v2729_v33, %v2727_v43  ;;  %v2478_v43 = vld [vmem:[#allocation13] ss:$0 sm:$0xff] }
0x12e0   :  { %2466 = vmatmul.mubr.msk.f32.vlgmr.msra.gmra.mxu0 %vm273_vm1, %v1960_v35 }
0x12e1   :  { %2504 = vmatprep.mubr.msk.bf16.mxu0 %vm2937_vm3, %v2936_v2  ;;  %2497 = vmatpush3.bf16.msra.mxu0 %v2554_v39 }
0x12e2   :  { %2498 = vmatprep.subr.bf16.mxu0 %v2936_v2 }
0x12e5   :  { %2499 = vmatpush3.bf16.msra.mxu0 %v2555_v11 }
0x12e6   :  { %2500 = vmatprep.subr.bf16.mxu0 %v2936_v2 }
0x12e9   :  { %2501 = vmatpush3.bf16.msra.mxu0 %v2556_v53 }
0x12ea   :  { %2502 = vmatprep.subr.bf16.mxu0 %v2936_v2 }
0x12ed   :  { %2503 = vmatpush3.bf16.msra.mxu0 %v2557_v29 }
0x13a0   :  { %v2030_v36 = vpop.f32.mrf.mxu0 }
0x13a1   :  { %v2035_v52 = vadd.f32 %v2030_v36, %v1352_v58 }
0x13a2   :  { %v2032_v55 = vpop.f32.mrf.mxu0 }
0x13a3   :  { %v2467_v1 = vmul.f32 -1.442695, %v2035_v52  ;;  %v2036_v40 = vadd.f32 %v2032_v55, %v1354_v56 }
0x13a5   :  { %2730 = vpow2.f32 %v2467_v1  ;;  %v2468_v34 = vmul.f32 -1.442695, %v2036_v40  ;;  %v2484_v1 = vld [vmem:[#allocation15] ss:$0 sm:$0xff] }
0x13a6   :  { %2732 = vtanh.f32 %v2036_v40 }
0x13b2   :  { %v2731_v37 = vpop.eup %2730 }
0x13b3   :  { %v2043_v38 = vadd.f32 1.0, %v2731_v37  ;;  %v2733_v25 = vpop.eup %2732 }
0x13b5   :  { %2734 = vrcp.f32 %v2043_v38  ;;  %v2485_v38 = vld [vmem:[#allocation3] ss:$0 sm:$0xff] }
0x13b6   :  { %2736 = vpow2.f32 %v2468_v34 }
0x13c2   :  { %v2735_v62 = vpop.eup %2734 }
0x13c3   :  { %v2051_v63 = vmul.f32 %v2735_v62, %v2733_v25  ;;  %v2737_v44 = vpop.eup %2736  ;;  %v2050_v7 = vmul.f32 %v2735_v62, %v1958_v32 }
0x13c4   :  { %v2044_v0 = vadd.f32 1.0, %v2737_v44 }
0x13c5   :  { %2053 = vrot.lane.b32.xlu0 %v2051_v63, %s2928_s19 }
0x13c6   :  { %2738 = vrcp.f32 %v2044_v0 }
0x13d3   :  { %v2739_v45 = vpop.eup %2738 }
0x1437   :  { %v2054_v9 = vpop.permute.xlu0 %2053 }
0x1438   :  { %v2056_v12 = vadd.f32 %v2054_v9, %v2050_v7 }
0x143a   :  { %2740 = vtanh.f32 %v2056_v12 }
0x1447   :  { %v2741_v4 = vpop.eup %2740 }
0x1448   :  { %v2058_v54 = vmul.f32 %v2741_v4, %v2739_v45 }
0x144a   :  { %2469 = vmatmul.mubr.msk.f32.vlgmr.msra.gmra.mxu1 %vm273_vm1, %v2058_v54 }
0x144b   :  { %2516 = vmatprep.mubr.msk.bf16.mxu1 %vm2937_vm3, %v2936_v2  ;;  %2509 = vmatpush3.bf16.msra.mxu1 %v2558_v30 }
0x144c   :  { %2510 = vmatprep.subr.bf16.mxu1 %v2936_v2 }
0x144f   :  { %2511 = vmatpush3.bf16.msra.mxu1 %v2559_v28 }
0x1450   :  { %2512 = vmatprep.subr.bf16.mxu1 %v2936_v2 }
0x1453   :  { %2513 = vmatpush3.bf16.msra.mxu1 %v2560_v23 }
0x1454   :  { %2514 = vmatprep.subr.bf16.mxu1 %v2936_v2 }
0x1457   :  { %2515 = vmatpush3.bf16.msra.mxu1 %v2561_v46 }
0x150a   :  { %v2128_v5 = vpop.f32.mrf.mxu1 }
0x150b   :  { %v2133_v6 = vadd.f32 %v2128_v5, %v1356_v50 }
0x150c   :  { %v2130_v10 = vpop.f32.mrf.mxu1 }
0x150d   :  { %v2470_v8 = vmul.f32 -1.442695, %v2133_v6  ;;  %v2134_v13 = vadd.f32 %v2130_v10, %v1358_v14 }
0x150f   :  { %2742 = vpow2.f32 %v2470_v8  ;;  %v2471_v41 = vmul.f32 -1.442695, %v2134_v13 }
0x1510   :  { %2744 = vtanh.f32 %v2134_v13 }
0x151c   :  { %v2743_v15 = vpop.eup %2742 }
0x151d   :  { %v2141_v24 = vadd.f32 1.0, %v2743_v15  ;;  %v2745_v27 = vpop.eup %2744 }
0x151f   :  { %2746 = vrcp.f32 %v2141_v24 }
0x1520   :  { %2748 = vpow2.f32 %v2471_v41 }
0x152c   :  { %v2747_v26 = vpop.eup %2746 }
0x152d   :  { %v2149_v61 = vmul.f32 %v2747_v26, %v2745_v27  ;;  %v2749_v57 = vpop.eup %2748  ;;  %v2148_v16 = vmul.f32 %v2747_v26, %v2056_v12 }
0x152e   :  { %v2142_v51 = vadd.f32 1.0, %v2749_v57 }
0x152f   :  { %2151 = vrot.lane.b32.xlu1 %v2149_v61, %s2928_s19 }
0x1530   :  { %2750 = vrcp.f32 %v2142_v51 }
0x153d   :  { %v2751_v19 = vpop.eup %2750 }
0x15a1   :  { %v2152_v17 = vpop.permute.xlu1 %2151 }
0x15a2   :  { %v2154_v18 = vadd.f32 %v2152_v17, %v2148_v16 }
0x15a4   :  { %2752 = vtanh.f32 %v2154_v18 }
0x15b1   :  { %v2753_v20 = vpop.eup %2752 }
0x15b2   :  { %v2156_v21 = vmul.f32 %v2753_v20, %v2751_v19 }
0x15b4   :  { %v2157_v22 = vpack.c.bf16 %v2156_v21, %v2156_v21 }
0x15b6   :  { %2505 = vmatmul.mubr.msk.bf16.vlgmr.msra.gmra.mxu0 %vm273_vm1, %v2157_v22 }
0x1676   :  { %v2234_v48 = vpop.f32.mrf.mxu0 }
0x1677   :  { %v2235_v3 = vadd.f32 %v2472_v47, %v2234_v48 }
0x1678   :  { %v2506_v59 = vpop.f32.mrf.mxu0 }
0x1679   :  { %vm2240_vm4 = vcmp.gt.f32.partialorder %v2235_v3, 0.0  ;;  %v2241_v60 = vmul.f32 0.01, %v2235_v3 }
0x167a   :  { %v2237_v49 = vpop.f32.mrf.mxu0 }
0x167b   :  { %v2242_v42 = vsel %vm2240_vm4, %v2235_v3, %v2241_v60 }
0x167c   :  { %v2243_v31 = vpack.c.bf16 %v2242_v42, %v2242_v42  ;;  %v2507_v32 = vpop.f32.mrf.mxu0 }
0x167e   :  { %2517 = vmatmul.mubr.msk.bf16.vlgmr.msra.gmra.mxu1 %vm273_vm1, %v2243_v31 }
0x173e   :  { %v2320_v33 = vpop.f32.mrf.mxu1 }
0x173f   :  { %v2321_v2 = vadd.f32 %v2478_v43, %v2320_v33 }
0x1740   :  { %v2518_v35 = vpop.f32.mrf.mxu1 }
0x1741   :  { %vm2326_vm5 = vcmp.gt.f32.partialorder %v2321_v2, 0.0  ;;  %v2327_v58 = vmul.f32 0.01, %v2321_v2 }
0x1742   :  { %v2323_v36 = vpop.f32.mrf.mxu1 }
0x1743   :  { %v2328_v52 = vsel %vm2326_vm5, %v2321_v2, %v2327_v58 }
0x1744   :  { %v2519_v55 = vpop.f32.mrf.mxu1  ;;  %v2329_v56 = vadd.f32 %v2328_v52, %v2156_v21 }
0x1746   :  { %v2337_v40 = vmul.f32 %v2484_v1, %v2329_v56 }
0x1748   :  { %v2338_v37 = vsel %vm273_vm1, %v2337_v40, 0.0 }
0x1749   :  { %2339 = vadd.xlane.f32.xlu0 %v2338_v37 }
0x17d2   :  { %v2340_v25 = vpop.xlane.xlu0 %2339 }
0x17d3   :  { %v2348_v62 = vadd.f32 %v2485_v38, %v2340_v25 }
0x17d5   :  { %vm2349_vm6 = vcmp.gt.f32.partialorder %v2348_v62, 0.0  ;;  %v2350_v63 = vmul.f32 0.01, %v2348_v62 }
0x17d7   :  { %v2351_v34 = vsel %vm2349_vm6, %v2348_v62, %v2350_v63 }
0x17d8   :  { %2352 = vxpose.xlu1.b32.start.end [1/1] (short) (narrow) %v2351_v34, 8 }
0x1854   :  { %v2368_v44 = vpop.trf.xlu1 }
0x1855   :  { %2385 = vst.msk [vmem:[#allocation16] sm:$0x1] %vm2384_vm7, %v2368_v44 }
0x1856   :  { %2905 = shalt.err (!%p2902_p11)
}
0x1857   :  { %2395 = dma.vmem_to_hbm [thread:$0]  %s2393_s25, 16, %s3721_s13, [#allocation6]  }
0x1858   :  { %2922 = dma.done.wait [#allocation6], 16  }
0x1859   :  { %2923 = vsyncadd [#allocation6], 4294967280 }
0x185a   :  { %2399 = vsyncpa [#allocation5], 1 }
0x185b   :  { %2400 = vsyncpa [#allocation8], 1 }
0x185c   :  { %2401 = vsyncpa [#allocation11], 1 }
0x185d   :  { %2402 = vsyncpa [#allocation14], 1 }
0x185e   :  { %2403 = vsyncpa [#allocation6], 1 }

</bundles_post_ra>
